<compile_context>
chip_gen: v7x
topology: tpu7x:2x2x1
jax: 0.10.0
libtpu: 0.0.40
codegen_flags: <defaults>
</compile_context>

<pallas_src>
from math import ceil

import jax
import jax.numpy as jnp
from jax.experimental import pallas as pl
from jax.experimental.pallas import tpu as pltpu

# ----------------------------- model config ---------------------------------
ATOM_MAX_NUM = 20          # synthetic choice (defines dims = ceil(0.6 * 20) = 12)
POOLING_RATIO = 0.6
DIMS = ceil(ATOM_MAX_NUM * POOLING_RATIO)   # 12  -> conv1 kernel height
HIDD_DIM = 32                               # must be even; H2 = 16
CONV_CHANNEL1 = 16
CONV_CHANNEL2 = 32
N_BLOCKS = 3                                # fixed by Conv2d(3, ...) in_channels
BATCH = 4                                   # 4 (h,t) pairs -> 8 towers per call


# ------------------------------ Pallas kernel --------------------------------
def _conv_tower_kernel(x_ref, w1_ref, w2_ref, bias_ref, out_ref):
    """Single-shot tower: conv1 + relu + maxpool(1,2) + conv2 + relu.

    x_ref    : [2*H2*NB, K1]  rows ordered (parity, h2, b);  K1 = 3*dims
    w1_ref   : [K1, C1]       conv1 weight, contraction-major
    w2_ref   : [H2, C1, C2]   conv2 weight, per-width slab
    bias_ref : [2, C2]        row 0 = b1 (padded), row 1 = b2
    out_ref  : [NB, C2]
    """
    rows, _ = x_ref.shape
    h2, c1, c2 = w2_ref.shape
    nb = out_ref.shape[0]
    half = rows // 2
    hi = jax.lax.Precision.HIGHEST

    # conv1 (kernel (dims, 1)) over ALL (parity, width, batch) positions as a
    # single 256-row MXU matmul.
    y = jnp.dot(x_ref[...], w1_ref[...],
                preferred_element_type=jnp.float32, precision=hi)
    y = jnp.maximum(y + bias_ref[0:1, :c1], 0.0)             # [2*H2*NB, C1]

    # MaxPool2d((1,2),(1,2)) == elementwise max of the even/odd-width halves
    # (rows are ordered (parity, h2, b), so the halves are contiguous slices).
    pooled = jnp.maximum(y[:half, :], y[half:, :])            # [H2*NB, C1]

    # conv2 (kernel (1, H2)) as H2 accumulating MXU matmuls on tile-aligned
    # slices (nb == 8 sublanes each).  No sublane->lane relayout, no scratch.
    acc = jnp.broadcast_to(bias_ref[1:2, :], (nb, c2))        # b2 folded in
    for h in range(h2):
        acc = acc + jnp.dot(pooled[h * nb:(h + 1) * nb, :], w2_ref[h],
                            preferred_element_type=jnp.float32, precision=hi)
    out_ref[...] = jnp.maximum(acc, 0.0)


# --------------------- one-time parameter layout (hoisted) -------------------
def prepare_conv_params(w1, b1, w2, b2):
    """Pre-lay-out conv weights once at init; NOT in the per-call hot path."""
    C1, Cin, KH, _ = w1.shape
    C2 = w2.shape[0]
    H2 = w2.shape[3]
    K1 = Cin * KH
    w1t = jnp.asarray(w1.reshape(C1, K1).T)                       # [K1, C1]
    w2s = jnp.asarray(jnp.transpose(w2[:, :, 0, :], (2, 1, 0)))   # [H2, C1, C2]
    bias = jnp.zeros((2, C2), jnp.float32)
    bias = bias.at[0, :C1].set(b1).at[1, :].set(b2)               # packed biases
    return w1t, w2s, bias


@jax.jit
def conv_tower_pallas(repr_x, w1t, w2s, bias):
    """repr_x: [NB, 3, dims, H] float32 (NCHW).  Returns [NB, C2]."""
    NB, Cin, KH, H = repr_x.shape
    H2, C1, C2 = w2s.shape
    K1 = Cin * KH
    assert H == 2 * H2, "hidd_dim must be even"

    # Per-call layout plumbing for the activation only (tiny, inside this jit):
    # flatten each conv1 receptive field to K1; order rows (parity, h2, b).
    x_k = jnp.transpose(repr_x, (3, 0, 1, 2)).reshape(H, NB, K1)       # [H, NB, K1]
    x = jnp.transpose(x_k.reshape(H2, 2, NB, K1),
                      (1, 0, 2, 3)).reshape(2 * H2 * NB, K1)           # [2*H2*NB, K1]

    vmem = lambda: pl.BlockSpec(memory_space=pltpu.MemorySpace.VMEM)
    return pl.pallas_call(
        _conv_tower_kernel,
        out_shape=jax.ShapeDtypeStruct((NB, C2), jnp.float32),
        in_specs=[vmem(), vmem(), vmem(), vmem()],
        out_specs=vmem(),
    )(x, w1t, w2s, bias)


# ----------------------- plain-JAX reference (for checking) ------------------
def conv_tower_ref(repr_x, w1, b1, w2, b2):
    dn = ("NCHW", "OIHW", "NCHW")
    hi = jax.lax.Precision.HIGHEST
    y = jax.lax.conv_general_dilated(repr_x, w1, (1, 1), "VALID",
                                     dimension_numbers=dn, precision=hi)
    y = jnp.maximum(y + b1[None, :, None, None], 0.0)
    y = jax.lax.reduce_window(y, -jnp.inf, jax.lax.max,
                              (1, 1, 1, 2), (1, 1, 1, 2), "VALID")
    y = jax.lax.conv_general_dilated(y, w2, (1, 1), "VALID",
                                     dimension_numbers=dn, precision=hi)
    y = jnp.maximum(y + b2[None, :, None, None], 0.0)
    return y.reshape(y.shape[0], -1)


# --------------------------------- driver ------------------------------------
if __name__ == "__main__":
    key = jax.random.PRNGKey(0)
    k_rh, k_rt, k_w1, k_b1, k_w2, k_b2 = jax.random.split(key, 6)

    # Stand-ins for the stacked graph-block outputs (see TODO above).
    repr_h = jax.random.normal(k_rh, (BATCH, N_BLOCKS, DIMS, HIDD_DIM),
                               dtype=jnp.float32)
    repr_t = jax.random.normal(k_rt, (BATCH, N_BLOCKS, DIMS, HIDD_DIM),
                               dtype=jnp.float32)

    # Deterministic parameter init (shapes per nn.Conv2d in DVRL.__init__).
    w1 = 0.1 * jax.random.normal(k_w1, (CONV_CHANNEL1, N_BLOCKS, DIMS, 1),
                                 dtype=jnp.float32)
    b1 = 0.1 * jax.random.normal(k_b1, (CONV_CHANNEL1,), dtype=jnp.float32)
    w2 = 0.1 * jax.random.normal(
        k_w2, (CONV_CHANNEL2, CONV_CHANNEL1, 1, HIDD_DIM // 2),
        dtype=jnp.float32)
    b2 = 0.1 * jax.random.normal(k_b2, (CONV_CHANNEL2,), dtype=jnp.float32)

    # One-time weight layout (hoisted out of the per-call path).
    w1t, w2s, bias = prepare_conv_params(w1, b1, w2, b2)
    w1t, w2s, bias = jax.block_until_ready((w1t, w2s, bias))

    # Head + tail towers for all pairs fused into ONE kernel call (8 towers).
    repr_cat = jnp.concatenate([repr_h, repr_t], axis=0)   # [2B, 3, dims, H]
    out = conv_tower_pallas(repr_cat, w1t, w2s, bias)
    out = jax.block_until_ready(out)
    out_h, out_t = out[:BATCH], out[BATCH:]

    # kge_heads / kge_tails as in DVRL.forward (view + unsqueeze(1) on host).
    kge_heads = out_h[:, None, :]   # [B, 1, C2]
    kge_tails = out_t[:, None, :]   # [B, 1, C2]

    # Verify against a plain-JAX reference of the same PyTorch semantics.
    ref_h = conv_tower_ref(repr_h, w1, b1, w2, b2)
    ref_t = conv_tower_ref(repr_t, w1, b1, w2, b2)
    assert kge_heads.shape == (BATCH, 1, CONV_CHANNEL2)
    assert jnp.allclose(out_h, ref_h, rtol=1e-5, atol=1e-5), "head mismatch"
    assert jnp.allclose(out_t, ref_t, rtol=1e-5, atol=1e-5), "tail mismatch"

    print("KERNEL_OK")
</pallas_src>

<mosaic_0001>
module attributes {stable_mosaic.version = 11 : i64} {
  func.func @_conv_tower_kernel(%arg0: memref<256x36xf32, #tpu.memory_space<vmem>>, %arg1: memref<36x16xf32, #tpu.memory_space<vmem>>, %arg2: memref<16x16x32xf32, #tpu.memory_space<vmem>>, %arg3: memref<2x32xf32, #tpu.memory_space<vmem>>, %arg4: memref<8x32xf32, #tpu.memory_space<vmem>>) attributes {dimension_semantics = [], scalar_prefetch = 0 : i64, scratch_operands = 0 : i64, tpu.core_type = #tpu.core_type<tc>} {
    %c0 = arith.constant 0 : index
    %c0_0 = arith.constant 0 : index
    %0 = vector.load %arg0[%c0, %c0_0] : memref<256x36xf32, #tpu.memory_space<vmem>>, vector<256x36xf32>
    %c0_1 = arith.constant 0 : index
    %c0_2 = arith.constant 0 : index
    %1 = vector.load %arg1[%c0_1, %c0_2] : memref<36x16xf32, #tpu.memory_space<vmem>>, vector<36x16xf32>
    %cst = arith.constant dense<0.000000e+00> : vector<256x16xf32>
    %2 = tpu.matmul %0, %1, %cst {dimension_numbers = #tpu.dot_dimension_numbers<[1], [0], [0], [1], [0, 0, 1, 1], [], []>, precision = #tpu.contract_precision<fp32>} : vector<256x36xf32>, vector<36x16xf32>, vector<256x16xf32> -> vector<256x16xf32>
    %c0_3 = arith.constant 0 : index
    %c0_4 = arith.constant 0 : index
    %3 = vector.load %arg3[%c0_3, %c0_4] : memref<2x32xf32, #tpu.memory_space<vmem>>, vector<1x16xf32>
    %4 = vector.broadcast %3 : vector<1x16xf32> to vector<256x16xf32>
    %5 = arith.addf %2, %4 : vector<256x16xf32>
    %cst_5 = arith.constant 0.000000e+00 : f32
    %6 = vector.broadcast %cst_5 : f32 to vector<256x16xf32>
    %7 = arith.maximumf %5, %6 : vector<256x16xf32>
    %8 = vector.extract_strided_slice %7 {offsets = [0, 0], sizes = [128, 16], strides = [1, 1]} : vector<256x16xf32> to vector<128x16xf32>
    %9 = vector.extract_strided_slice %7 {offsets = [128, 0], sizes = [128, 16], strides = [1, 1]} : vector<256x16xf32> to vector<128x16xf32>
    %10 = arith.maximumf %8, %9 : vector<128x16xf32>
    %c1 = arith.constant 1 : index
    %c0_6 = arith.constant 0 : index
    %11 = vector.load %arg3[%c1, %c0_6] : memref<2x32xf32, #tpu.memory_space<vmem>>, vector<1x32xf32>
    %12 = vector.shape_cast %11 : vector<1x32xf32> to vector<1x32xf32>
    %13 = vector.broadcast %12 : vector<1x32xf32> to vector<8x32xf32>
    %14 = vector.extract_strided_slice %10 {offsets = [0, 0], sizes = [8, 16], strides = [1, 1]} : vector<128x16xf32> to vector<8x16xf32>
    %c0_7 = arith.constant 0 : index
    %c0_8 = arith.constant 0 : index
    %c0_9 = arith.constant 0 : index
    %15 = vector.load %arg2[%c0_7, %c0_8, %c0_9] : memref<16x16x32xf32, #tpu.memory_space<vmem>>, vector<1x16x32xf32>
    %16 = vector.shape_cast %15 : vector<1x16x32xf32> to vector<16x32xf32>
    %cst_10 = arith.constant dense<0.000000e+00> : vector<8x32xf32>
    %17 = tpu.matmul %14, %16, %cst_10 {dimension_numbers = #tpu.dot_dimension_numbers<[1], [0], [0], [1], [0, 0, 1, 1], [], []>, precision = #tpu.contract_precision<fp32>} : vector<8x16xf32>, vector<16x32xf32>, vector<8x32xf32> -> vector<8x32xf32>
    %18 = arith.addf %13, %17 : vector<8x32xf32>
    %19 = vector.extract_strided_slice %10 {offsets = [8, 0], sizes = [8, 16], strides = [1, 1]} : vector<128x16xf32> to vector<8x16xf32>
    %c1_11 = arith.constant 1 : index
    %c0_12 = arith.constant 0 : index
    %c0_13 = arith.constant 0 : index
    %20 = vector.load %arg2[%c1_11, %c0_12, %c0_13] : memref<16x16x32xf32, #tpu.memory_space<vmem>>, vector<1x16x32xf32>
    %21 = vector.shape_cast %20 : vector<1x16x32xf32> to vector<16x32xf32>
    %cst_14 = arith.constant dense<0.000000e+00> : vector<8x32xf32>
    %22 = tpu.matmul %19, %21, %cst_14 {dimension_numbers = #tpu.dot_dimension_numbers<[1], [0], [0], [1], [0, 0, 1, 1], [], []>, precision = #tpu.contract_precision<fp32>} : vector<8x16xf32>, vector<16x32xf32>, vector<8x32xf32> -> vector<8x32xf32>
    %23 = arith.addf %18, %22 : vector<8x32xf32>
    %24 = vector.extract_strided_slice %10 {offsets = [16, 0], sizes = [8, 16], strides = [1, 1]} : vector<128x16xf32> to vector<8x16xf32>
    %c2 = arith.constant 2 : index
    %c0_15 = arith.constant 0 : index
    %c0_16 = arith.constant 0 : index
    %25 = vector.load %arg2[%c2, %c0_15, %c0_16] : memref<16x16x32xf32, #tpu.memory_space<vmem>>, vector<1x16x32xf32>
    %26 = vector.shape_cast %25 : vector<1x16x32xf32> to vector<16x32xf32>
    %cst_17 = arith.constant dense<0.000000e+00> : vector<8x32xf32>
    %27 = tpu.matmul %24, %26, %cst_17 {dimension_numbers = #tpu.dot_dimension_numbers<[1], [0], [0], [1], [0, 0, 1, 1], [], []>, precision = #tpu.contract_precision<fp32>} : vector<8x16xf32>, vector<16x32xf32>, vector<8x32xf32> -> vector<8x32xf32>
    %28 = arith.addf %23, %27 : vector<8x32xf32>
    %29 = vector.extract_strided_slice %10 {offsets = [24, 0], sizes = [8, 16], strides = [1, 1]} : vector<128x16xf32> to vector<8x16xf32>
    %c3 = arith.constant 3 : index
    %c0_18 = arith.constant 0 : index
    %c0_19 = arith.constant 0 : index
    %30 = vector.load %arg2[%c3, %c0_18, %c0_19] : memref<16x16x32xf32, #tpu.memory_space<vmem>>, vector<1x16x32xf32>
    %31 = vector.shape_cast %30 : vector<1x16x32xf32> to vector<16x32xf32>
    %cst_20 = arith.constant dense<0.000000e+00> : vector<8x32xf32>
    %32 = tpu.matmul %29, %31, %cst_20 {dimension_numbers = #tpu.dot_dimension_numbers<[1], [0], [0], [1], [0, 0, 1, 1], [], []>, precision = #tpu.contract_precision<fp32>} : vector<8x16xf32>, vector<16x32xf32>, vector<8x32xf32> -> vector<8x32xf32>
    %33 = arith.addf %28, %32 : vector<8x32xf32>
    %34 = vector.extract_strided_slice %10 {offsets = [32, 0], sizes = [8, 16], strides = [1, 1]} : vector<128x16xf32> to vector<8x16xf32>
    %c4 = arith.constant 4 : index
    %c0_21 = arith.constant 0 : index
    %c0_22 = arith.constant 0 : index
    %35 = vector.load %arg2[%c4, %c0_21, %c0_22] : memref<16x16x32xf32, #tpu.memory_space<vmem>>, vector<1x16x32xf32>
    %36 = vector.shape_cast %35 : vector<1x16x32xf32> to vector<16x32xf32>
    %cst_23 = arith.constant dense<0.000000e+00> : vector<8x32xf32>
    %37 = tpu.matmul %34, %36, %cst_23 {dimension_numbers = #tpu.dot_dimension_numbers<[1], [0], [0], [1], [0, 0, 1, 1], [], []>, precision = #tpu.contract_precision<fp32>} : vector<8x16xf32>, vector<16x32xf32>, vector<8x32xf32> -> vector<8x32xf32>
    %38 = arith.addf %33, %37 : vector<8x32xf32>
    %39 = vector.extract_strided_slice %10 {offsets = [40, 0], sizes = [8, 16], strides = [1, 1]} : vector<128x16xf32> to vector<8x16xf32>
    %c5 = arith.constant 5 : index
    %c0_24 = arith.constant 0 : index
    %c0_25 = arith.constant 0 : index
    %40 = vector.load %arg2[%c5, %c0_24, %c0_25] : memref<16x16x32xf32, #tpu.memory_space<vmem>>, vector<1x16x32xf32>
    %41 = vector.shape_cast %40 : vector<1x16x32xf32> to vector<16x32xf32>
    %cst_26 = arith.constant dense<0.000000e+00> : vector<8x32xf32>
    %42 = tpu.matmul %39, %41, %cst_26 {dimension_numbers = #tpu.dot_dimension_numbers<[1], [0], [0], [1], [0, 0, 1, 1], [], []>, precision = #tpu.contract_precision<fp32>} : vector<8x16xf32>, vector<16x32xf32>, vector<8x32xf32> -> vector<8x32xf32>
    %43 = arith.addf %38, %42 : vector<8x32xf32>
    %44 = vector.extract_strided_slice %10 {offsets = [48, 0], sizes = [8, 16], strides = [1, 1]} : vector<128x16xf32> to vector<8x16xf32>
    %c6 = arith.constant 6 : index
    %c0_27 = arith.constant 0 : index
    %c0_28 = arith.constant 0 : index
    %45 = vector.load %arg2[%c6, %c0_27, %c0_28] : memref<16x16x32xf32, #tpu.memory_space<vmem>>, vector<1x16x32xf32>
    %46 = vector.shape_cast %45 : vector<1x16x32xf32> to vector<16x32xf32>
    %cst_29 = arith.constant dense<0.000000e+00> : vector<8x32xf32>
    %47 = tpu.matmul %44, %46, %cst_29 {dimension_numbers = #tpu.dot_dimension_numbers<[1], [0], [0], [1], [0, 0, 1, 1], [], []>, precision = #tpu.contract_precision<fp32>} : vector<8x16xf32>, vector<16x32xf32>, vector<8x32xf32> -> vector<8x32xf32>
    %48 = arith.addf %43, %47 : vector<8x32xf32>
    %49 = vector.extract_strided_slice %10 {offsets = [56, 0], sizes = [8, 16], strides = [1, 1]} : vector<128x16xf32> to vector<8x16xf32>
    %c7 = arith.constant 7 : index
    %c0_30 = arith.constant 0 : index
    %c0_31 = arith.constant 0 : index
    %50 = vector.load %arg2[%c7, %c0_30, %c0_31] : memref<16x16x32xf32, #tpu.memory_space<vmem>>, vector<1x16x32xf32>
    %51 = vector.shape_cast %50 : vector<1x16x32xf32> to vector<16x32xf32>
    %cst_32 = arith.constant dense<0.000000e+00> : vector<8x32xf32>
    %52 = tpu.matmul %49, %51, %cst_32 {dimension_numbers = #tpu.dot_dimension_numbers<[1], [0], [0], [1], [0, 0, 1, 1], [], []>, precision = #tpu.contract_precision<fp32>} : vector<8x16xf32>, vector<16x32xf32>, vector<8x32xf32> -> vector<8x32xf32>
    %53 = arith.addf %48, %52 : vector<8x32xf32>
    %54 = vector.extract_strided_slice %10 {offsets = [64, 0], sizes = [8, 16], strides = [1, 1]} : vector<128x16xf32> to vector<8x16xf32>
    %c8 = arith.constant 8 : index
    %c0_33 = arith.constant 0 : index
    %c0_34 = arith.constant 0 : index
    %55 = vector.load %arg2[%c8, %c0_33, %c0_34] : memref<16x16x32xf32, #tpu.memory_space<vmem>>, vector<1x16x32xf32>
    %56 = vector.shape_cast %55 : vector<1x16x32xf32> to vector<16x32xf32>
    %cst_35 = arith.constant dense<0.000000e+00> : vector<8x32xf32>
    %57 = tpu.matmul %54, %56, %cst_35 {dimension_numbers = #tpu.dot_dimension_numbers<[1], [0], [0], [1], [0, 0, 1, 1], [], []>, precision = #tpu.contract_precision<fp32>} : vector<8x16xf32>, vector<16x32xf32>, vector<8x32xf32> -> vector<8x32xf32>
    %58 = arith.addf %53, %57 : vector<8x32xf32>
    %59 = vector.extract_strided_slice %10 {offsets = [72, 0], sizes = [8, 16], strides = [1, 1]} : vector<128x16xf32> to vector<8x16xf32>
    %c9 = arith.constant 9 : index
    %c0_36 = arith.constant 0 : index
    %c0_37 = arith.constant 0 : index
    %60 = vector.load %arg2[%c9, %c0_36, %c0_37] : memref<16x16x32xf32, #tpu.memory_space<vmem>>, vector<1x16x32xf32>
    %61 = vector.shape_cast %60 : vector<1x16x32xf32> to vector<16x32xf32>
    %cst_38 = arith.constant dense<0.000000e+00> : vector<8x32xf32>
    %62 = tpu.matmul %59, %61, %cst_38 {dimension_numbers = #tpu.dot_dimension_numbers<[1], [0], [0], [1], [0, 0, 1, 1], [], []>, precision = #tpu.contract_precision<fp32>} : vector<8x16xf32>, vector<16x32xf32>, vector<8x32xf32> -> vector<8x32xf32>
    %63 = arith.addf %58, %62 : vector<8x32xf32>
    %64 = vector.extract_strided_slice %10 {offsets = [80, 0], sizes = [8, 16], strides = [1, 1]} : vector<128x16xf32> to vector<8x16xf32>
    %c10 = arith.constant 10 : index
    %c0_39 = arith.constant 0 : index
    %c0_40 = arith.constant 0 : index
    %65 = vector.load %arg2[%c10, %c0_39, %c0_40] : memref<16x16x32xf32, #tpu.memory_space<vmem>>, vector<1x16x32xf32>
    %66 = vector.shape_cast %65 : vector<1x16x32xf32> to vector<16x32xf32>
    %cst_41 = arith.constant dense<0.000000e+00> : vector<8x32xf32>
    %67 = tpu.matmul %64, %66, %cst_41 {dimension_numbers = #tpu.dot_dimension_numbers<[1], [0], [0], [1], [0, 0, 1, 1], [], []>, precision = #tpu.contract_precision<fp32>} : vector<8x16xf32>, vector<16x32xf32>, vector<8x32xf32> -> vector<8x32xf32>
    %68 = arith.addf %63, %67 : vector<8x32xf32>
    %69 = vector.extract_strided_slice %10 {offsets = [88, 0], sizes = [8, 16], strides = [1, 1]} : vector<128x16xf32> to vector<8x16xf32>
    %c11 = arith.constant 11 : index
    %c0_42 = arith.constant 0 : index
    %c0_43 = arith.constant 0 : index
    %70 = vector.load %arg2[%c11, %c0_42, %c0_43] : memref<16x16x32xf32, #tpu.memory_space<vmem>>, vector<1x16x32xf32>
    %71 = vector.shape_cast %70 : vector<1x16x32xf32> to vector<16x32xf32>
    %cst_44 = arith.constant dense<0.000000e+00> : vector<8x32xf32>
    %72 = tpu.matmul %69, %71, %cst_44 {dimension_numbers = #tpu.dot_dimension_numbers<[1], [0], [0], [1], [0, 0, 1, 1], [], []>, precision = #tpu.contract_precision<fp32>} : vector<8x16xf32>, vector<16x32xf32>, vector<8x32xf32> -> vector<8x32xf32>
    %73 = arith.addf %68, %72 : vector<8x32xf32>
    %74 = vector.extract_strided_slice %10 {offsets = [96, 0], sizes = [8, 16], strides = [1, 1]} : vector<128x16xf32> to vector<8x16xf32>
    %c12 = arith.constant 12 : index
    %c0_45 = arith.constant 0 : index
    %c0_46 = arith.constant 0 : index
    %75 = vector.load %arg2[%c12, %c0_45, %c0_46] : memref<16x16x32xf32, #tpu.memory_space<vmem>>, vector<1x16x32xf32>
    %76 = vector.shape_cast %75 : vector<1x16x32xf32> to vector<16x32xf32>
    %cst_47 = arith.constant dense<0.000000e+00> : vector<8x32xf32>
    %77 = tpu.matmul %74, %76, %cst_47 {dimension_numbers = #tpu.dot_dimension_numbers<[1], [0], [0], [1], [0, 0, 1, 1], [], []>, precision = #tpu.contract_precision<fp32>} : vector<8x16xf32>, vector<16x32xf32>, vector<8x32xf32> -> vector<8x32xf32>
    %78 = arith.addf %73, %77 : vector<8x32xf32>
    %79 = vector.extract_strided_slice %10 {offsets = [104, 0], sizes = [8, 16], strides = [1, 1]} : vector<128x16xf32> to vector<8x16xf32>
    %c13 = arith.constant 13 : index
    %c0_48 = arith.constant 0 : index
    %c0_49 = arith.constant 0 : index
    %80 = vector.load %arg2[%c13, %c0_48, %c0_49] : memref<16x16x32xf32, #tpu.memory_space<vmem>>, vector<1x16x32xf32>
    %81 = vector.shape_cast %80 : vector<1x16x32xf32> to vector<16x32xf32>
    %cst_50 = arith.constant dense<0.000000e+00> : vector<8x32xf32>
    %82 = tpu.matmul %79, %81, %cst_50 {dimension_numbers = #tpu.dot_dimension_numbers<[1], [0], [0], [1], [0, 0, 1, 1], [], []>, precision = #tpu.contract_precision<fp32>} : vector<8x16xf32>, vector<16x32xf32>, vector<8x32xf32> -> vector<8x32xf32>
    %83 = arith.addf %78, %82 : vector<8x32xf32>
    %84 = vector.extract_strided_slice %10 {offsets = [112, 0], sizes = [8, 16], strides = [1, 1]} : vector<128x16xf32> to vector<8x16xf32>
    %c14 = arith.constant 14 : index
    %c0_51 = arith.constant 0 : index
    %c0_52 = arith.constant 0 : index
    %85 = vector.load %arg2[%c14, %c0_51, %c0_52] : memref<16x16x32xf32, #tpu.memory_space<vmem>>, vector<1x16x32xf32>
    %86 = vector.shape_cast %85 : vector<1x16x32xf32> to vector<16x32xf32>
    %cst_53 = arith.constant dense<0.000000e+00> : vector<8x32xf32>
    %87 = tpu.matmul %84, %86, %cst_53 {dimension_numbers = #tpu.dot_dimension_numbers<[1], [0], [0], [1], [0, 0, 1, 1], [], []>, precision = #tpu.contract_precision<fp32>} : vector<8x16xf32>, vector<16x32xf32>, vector<8x32xf32> -> vector<8x32xf32>
    %88 = arith.addf %83, %87 : vector<8x32xf32>
    %89 = vector.extract_strided_slice %10 {offsets = [120, 0], sizes = [8, 16], strides = [1, 1]} : vector<128x16xf32> to vector<8x16xf32>
    %c15 = arith.constant 15 : index
    %c0_54 = arith.constant 0 : index
    %c0_55 = arith.constant 0 : index
    %90 = vector.load %arg2[%c15, %c0_54, %c0_55] : memref<16x16x32xf32, #tpu.memory_space<vmem>>, vector<1x16x32xf32>
    %91 = vector.shape_cast %90 : vector<1x16x32xf32> to vector<16x32xf32>
    %cst_56 = arith.constant dense<0.000000e+00> : vector<8x32xf32>
    %92 = tpu.matmul %89, %91, %cst_56 {dimension_numbers = #tpu.dot_dimension_numbers<[1], [0], [0], [1], [0, 0, 1, 1], [], []>, precision = #tpu.contract_precision<fp32>} : vector<8x16xf32>, vector<16x32xf32>, vector<8x32xf32> -> vector<8x32xf32>
    %93 = arith.addf %88, %92 : vector<8x32xf32>
    %cst_57 = arith.constant 0.000000e+00 : f32
    %94 = vector.broadcast %cst_57 : f32 to vector<8x32xf32>
    %95 = arith.maximumf %93, %94 : vector<8x32xf32>
    %c0_58 = arith.constant 0 : index
    %c0_59 = arith.constant 0 : index
    %96 = vector.load %arg4[%c0_58, %c0_59] : memref<8x32xf32, #tpu.memory_space<vmem>>, vector<8x32xf32>
    tpu.vector_store %arg4[%c0_58, %c0_59], %95 {strides = array<i32>} : memref<8x32xf32, #tpu.memory_space<vmem>>, vector<8x32xf32>,
    return
  }
}

</mosaic_0001>

<bundles_post_ra>
// kernel: conv_tower_pallas.1
= control target key start
LH: loop header
LB: loop body
LE: loop exit
PB: predicated region body
PF: predicated region fallthrough
CT: control target
= control target key end

     0   :  { %vm157_vm0 = vcmask 1043456   ;;  %vm60_vm1 = vcmask 293888   ;;  %s13154_s0 = inlined_call_operand.vmem [shape: f32[256,36], index: 0, kind: input, shape index: {}]   ;;  %s13155_s1 = inlined_call_operand.vmem [shape: f32[36,16], index: 1, kind: input, shape index: {}]   ;;  %s13156_s2 = inlined_call_operand.vmem [shape: f32[16,16,32], index: 2, kind: input, shape index: {}]   ;;  %s13157_s3 = inlined_call_operand.vmem [shape: f32[2,32], index: 3, kind: input, shape index: {}]   ;;  %s13158_s4 = inlined_call_operand.hbm [shape: f32[8,32], index: 4, kind: output, shape index: {}]  }
   0x1   :  { %v50_v0 = vld [vmem:[%s13155_s1] sm:$0xff]  ;;  %v51_v1 = vld [vmem:[%s13155_s1 + $0x8] sm:$0xff]  ;;  %v11865_v2 = vld [vmem:[%s13155_s1 + $0x10] sm:$0xff] }
   0x2   :  { %v162_v3 = vand.u32 4294901760, %v50_v0  ;;  %v165_v4 = vand.u32 4294901760, %v51_v1  ;;  %v11870_v5 = vld [vmem:[%s13155_s1 + $0x18] sm:$0xff]  ;;  %v168_v6 = vand.u32 4294901760, %v11865_v2  ;;  %v54_v7 = vld [vmem:[%s13155_s1 + $0x20] sm:$0xf] }
   0x3   :  { %v171_v8 = vand.u32 4294901760, %v11870_v5  ;;  %v11877_v9 = vsel %vm157_vm0, %v54_v7, 0  ;;  %v18_v10 = vld [vmem:[%s13154_s0] sm:$0xff]  ;;  %v19_v11 = vld [vmem:[%s13154_s0 + $0x8] sm:$0xff]  ;;  %v20_v12 = vld [vmem:[%s13154_s0 + $0x10] sm:$0xff] }
   0x4   :  { %v11888_v13 = vpack.c.bf16 %v165_v4, %v162_v3  ;;  %v11891_v14 = vand.u32 4294901760, %v11877_v9  ;;  %v62_v15 = vsel %vm60_vm1, %v18_v10, 0  ;;  %v65_v16 = vsel %vm60_vm1, %v19_v11, 0  ;;  %v21_v17 = vld [vmem:[%s13154_s0 + $0x18] sm:$0xff]  ;;  %v22_v18 = vld [vmem:[%s13154_s0 + $0x20] sm:$0xff]  ;;  %v23_v23 = vld [vmem:[%s13154_s0 + $0x28] sm:$0xff] }
   0x5   :  { %v11905_v19 = vpack.c.bf16 %v171_v8, %v168_v6  ;;  %v11907_v20 = vand.u32 4294901760, %v62_v15  ;;  %v11909_v21 = vand.u32 4294901760, %v65_v16  ;;  %v11911_v22 = vsub.f32 %v50_v0, %v162_v3  ;;  %v24_v44 = vld [vmem:[%s13154_s0 + $0x30] sm:$0xff]  ;;  %v25_v53 = vld [vmem:[%s13154_s0 + $0x38] sm:$0xff]  ;;  %v26_v54 = vld [vmem:[%s13154_s0 + $0x40] sm:$0xff] }
   0x6   :  { %13262 = vst [vmem:[#allocation5_spill] sm:$0xff] %v11891_v14  ;;  %11081 = vmatprep.subr.bf16.mxu0 %v11888_v13  ;;  %v11917_v24 = vsub.f32 %v51_v1, %v165_v4  ;;  %v68_v25 = vsel %vm60_vm1, %v20_v12, 0  ;;  %v71_v26 = vsel %vm60_vm1, %v21_v17, 0  ;;  %v74_v27 = vsel %vm60_vm1, %v22_v18, 0  ;;  %v27_v63 = vld [vmem:[%s13154_s0 + $0x48] sm:$0xff]  ;;  %v28_v0 = vld [vmem:[%s13154_s0 + $0x50] sm:$0xff] }
   0x7   :  { %11083 = vmatpush3.bf16.msra.mxu0 %v11888_v13  ;;  %v11924_v28 = vsub.f32 %v62_v15, %v11907_v20  ;;  %v11927_v29 = vsub.f32 %v65_v16, %v11909_v21  ;;  %v13178_v30 = vand.u32 4294901760, %v11911_v22  ;;  %v11930_v31 = vand.u32 4294901760, %v68_v25 }
   0x8   :  { %11085 = vmatprep.subr.bf16.mxu0 %v11905_v19  ;;  %v13177_v32 = vand.u32 4294901760, %v11917_v24  ;;  %v11934_v33 = vand.u32 4294901760, %v71_v26  ;;  %v11936_v34 = vand.u32 4294901760, %v74_v27  ;;  %v77_v35 = vsel %vm60_vm1, %v23_v23, 0 }
   0x9   :  { %v13175_v36 = vand.u32 4294901760, %v11924_v28  ;;  %v13170_v37 = vand.u32 4294901760, %v11927_v29  ;;  %v555_v38 = vsub.f32 %v11911_v22, %v13178_v30  ;;  %v11945_v39 = vsub.f32 %v68_v25, %v11930_v31 }
   0xa   :  { %v562_v40 = vsub.f32 %v11917_v24, %v13177_v32  ;;  %v11951_v41 = vsub.f32 %v71_v26, %v11934_v33  ;;  %v11954_v42 = vsub.f32 %v74_v27, %v11936_v34  ;;  %v11956_v43 = vand.u32 4294901760, %v77_v35 }
   0xb   :  { %11087 = vmatpush3.bf16.msra.mxu0 %v11905_v19  ;;  %v234_v45 = vsub.f32 %v11924_v28, %v13175_v36  ;;  %v244_v46 = vsub.f32 %v11927_v29, %v13170_v37  ;;  %v556_v47 = vand.u32 4294901760, %v555_v38  ;;  %v13168_v48 = vand.u32 4294901760, %v11945_v39 }
   0xc   :  { %10068 = vmatprep.subr.mxu0 %v11891_v14  ;;  %v563_v49 = vand.u32 4294901760, %v562_v40  ;;  %v13167_v50 = vand.u32 4294901760, %v11951_v41  ;;  %v13166_v51 = vand.u32 4294901760, %v11954_v42  ;;  %v11973_v52 = vsub.f32 %v77_v35, %v11956_v43 }
   0xd   :  { %v235_v55 = vand.u32 4294901760, %v234_v45  ;;  %v245_v56 = vand.u32 4294901760, %v244_v46  ;;  %v254_v57 = vsub.f32 %v11945_v39, %v13168_v48  ;;  %v80_v58 = vsel %vm60_vm1, %v24_v44, 0 }
   0xe   :  { %13263 = vst [vmem:[#allocation6_spill] sm:$0xff] %v11973_v52  ;;  %v11088_v59 = vpack.c.bf16 %v563_v49, %v556_v47  ;;  %v264_v60 = vsub.f32 %v11951_v41, %v13167_v50  ;;  %v274_v61 = vsub.f32 %v11954_v42, %v13166_v51  ;;  %v13165_v62 = vand.u32 4294901760, %v11973_v52 }
   0xf   :  { %9 = vsyncpa [#allocation3], 0  ;;  %10069 = vmatpush3.msra.mxu0 %v11891_v14  ;;  %10070 = vmatprep.mubr.f32.mxu0 %v235_v55  ;;  %v255_v1 = vand.u32 4294901760, %v254_v57  ;;  %v11999_v3 = vand.u32 4294901760, %v80_v58  ;;  %v83_v4 = vsel %vm60_vm1, %v25_v53, 0  ;;  %v86_v7 = vsel %vm60_vm1, %v26_v54, 0 }
  0x10   :  { %10071 = vmatmul.mubr.f32.vlgmr.msra.gmra.mrb[0].mxu0 %v245_v56  ;;  %11089 = vmatprep.subr.bf16.mxu0 %v11088_v59  ;;  %v265_v10 = vand.u32 4294901760, %v264_v60  ;;  %v275_v11 = vand.u32 4294901760, %v274_v61  ;;  %v284_v12 = vsub.f32 %v11973_v52, %v13165_v62  ;;  %v12006_v15 = vand.u32 4294901760, %v83_v4  ;;  %v29_v16 = vld [vmem:[%s13154_s0 + $0x58] sm:$0xff]  ;;  %v30_v61 = vld [vmem:[%s13154_s0 + $0x60] sm:$0xff]  ;;  %v36_v62 = vld [vmem:[%s13154_s0 + $0x90] sm:$0xff] }
  0x11   :  { %11091 = vmatpush3.bf16.msra.mxu0 %v11088_v59  ;;  %10073 = vmatprep.mubr.f32.mxu0 %v255_v1  ;;  %v12012_v17 = vsub.f32 %v80_v58, %v11999_v3  ;;  %v12014_v18 = vand.u32 4294901760, %v86_v7  ;;  %v89_v23 = vsel %vm60_vm1, %v27_v63, 0  ;;  %v92_v25 = vsel %vm60_vm1, %v28_v0, 0  ;;  %v42_v30 = vld [vmem:[%s13154_s0 + $0xc0] sm:$0xff]  ;;  %s11830_s18 = smov [#allocation2]  }
  0x12   :  { %v285_v26 = vand.u32 4294901760, %v284_v12  ;;  %v12019_v27 = vsub.f32 %v83_v4, %v12006_v15  ;;  %v12021_v35 = vand.u32 4294901760, %v89_v23  ;;  %v12023_v38 = vand.u32 4294901760, %v92_v25  ;;  %v32_v12 = vld [vmem:[%s13154_s0 + $0x70] sm:$0xff]  ;;  %s9510_s19 = sshll.u32 %s11830_s18, 4  ;;  %s9511_s19 = int_to_ptr.vmem [resolvable:$true] %s9510_s19 }
  0x13   :  { %13264 = vst [vmem:[#allocation7_spill] sm:$0xff] %v12012_v17  ;;  %v13164_v40 = vand.u32 4294901760, %v12012_v17  ;;  %v12027_v44 = vsub.f32 %v86_v7, %v12014_v18  ;;  %v95_v45 = vsel %vm60_vm1, %v29_v16, 0  ;;  %v12033_v46 = vsub.f32 %v11865_v2, %v168_v6  ;;  %v33_v16 = vld [vmem:[%s13154_s0 + $0x78] sm:$0xff]  ;;  %s11803_s20 = scalar_lea.vmem %s9511_s19, 128  ;;  %p11808_p1 = scmp.lt.s32.totalorder %s9511_s19, %s9511_s19 }
  0x14   :  { %13265 = vst [vmem:[#allocation8_spill] sm:$0xff] %v12019_v27  ;;  %10074 = vmatmul.mubr.f32.gmra.mrb[2].mxu0 %v265_v10  ;;  %v13163_v47 = vand.u32 4294901760, %v12019_v27  ;;  %v12037_v49 = vsub.f32 %v89_v23, %v12021_v35  ;;  %v12040_v53 = vsub.f32 %v92_v25, %v12023_v38  ;;  %v12042_v54 = vand.u32 4294901760, %v95_v45  ;;  %p11804_p0 = scmp.ne.s32.totalorder %s9511_s19, %s11803_s20  ;;  %p11809_p2 = scmp.lt.s32.totalorder %s11803_s20, %s11803_s20 }
  0x15   :  { %13266 = vst [vmem:[#allocation9_spill] sm:$0xff] %v12027_v44  ;;  %10076 = vmatprep.mubr.f32.mxu0 %v275_v11  ;;  %v294_v55 = vsub.f32 %v12012_v17, %v13164_v40  ;;  %v13161_v56 = vand.u32 4294901760, %v12027_v44  ;;  %v13172_v2 = vand.u32 4294901760, %v12033_v46  ;;  %v12052_v6 = vsub.f32 %v11870_v5, %v171_v8  ;;  %v31_v11 = vld [vmem:[%s13154_s0 + $0x68] sm:$0xff] }
  0x16   :  { %13267 = vst [vmem:[#allocation10_spill] sm:$0xff] %v12037_v49  ;;  %13268 = vst [vmem:[#allocation11_spill] sm:$0xff] %v12040_v53  ;;  %v304_v57 = vsub.f32 %v12019_v27, %v13163_v47  ;;  %v13160_v58 = vand.u32 4294901760, %v12037_v49  ;;  %v13159_v59 = vand.u32 4294901760, %v12040_v53  ;;  %v12060_v60 = vsub.f32 %v95_v45, %v12042_v54  ;;  %p11810_p3 = por %p11809_p2, %p11808_p1 }
  0x17   :  { %v295_v63 = vand.u32 4294901760, %v294_v55  ;;  %v314_v5 = vsub.f32 %v12027_v44, %v13161_v56  ;;  %v569_v8 = vsub.f32 %v12033_v46, %v13172_v2  ;;  %v13171_v0 = vand.u32 4294901760, %v12052_v6  ;;  %v47_v44 = vld [vmem:[%s13154_s0 + $0xe8] sm:$0xff] }
  0x18   :  { %13269 = vst [vmem:[#allocation12_spill] sm:$0xff] %v12060_v60  ;;  %10077 = vmatmul.mubr.f32.gmra.mrb[4].mxu0 %v285_v26  ;;  %v305_v1 = vand.u32 4294901760, %v304_v57  ;;  %v324_v4 = vsub.f32 %v12037_v49, %v13160_v58  ;;  %v334_v7 = vsub.f32 %v12040_v53, %v13159_v59  ;;  %v13162_v10 = vand.u32 4294901760, %v12060_v60  ;;  %p11811_p4 = pnand %p11810_p3, %p11804_p0 }
  0x19   :  { %10079 = vmatprep.mubr.f32.mxu0 %v295_v63  ;;  %v315_v23 = vand.u32 4294901760, %v314_v5  ;;  %v570_v25 = vand.u32 4294901760, %v569_v8  ;;  %v576_v26 = vsub.f32 %v12052_v6, %v13171_v0  ;;  %v98_v45 = vsel %vm60_vm1, %v30_v61, 0  ;;  %v34_v63 = vld [vmem:[%s13154_s0 + $0x80] sm:$0xff]  ;;  %v35_v5 = vld [vmem:[%s13154_s0 + $0x88] sm:$0xff]  ;;  %v41_v0 = vld [vmem:[%s13154_s0 + $0xb8] sm:$0xff] }
  0x1a   :  { %v325_v55 = vand.u32 4294901760, %v324_v4  ;;  %v335_v57 = vand.u32 4294901760, %v334_v7  ;;  %v344_v59 = vsub.f32 %v12060_v60, %v13162_v10  ;;  %v12095_v58 = vand.u32 4294901760, %v98_v45 }
  0x1b   :  { %v577_v8 = vand.u32 4294901760, %v576_v26  ;;  %v101_v56 = vsel %vm60_vm1, %v31_v11, 0  ;;  %v104_v61 = vsel %vm60_vm1, %v32_v12, 0  ;;  %v107_v4 = vsel %vm60_vm1, %v33_v16, 0  ;;  %v37_v11 = vld [vmem:[%s13154_s0 + $0x98] sm:$0xff] }
  0x1c   :  { %10080 = vmatmul.mubr.f32.gmra.mrb[6].mxu0 %v305_v1  ;;  %v345_v7 = vand.u32 4294901760, %v344_v59  ;;  %v12107_v10 = vsub.f32 %v98_v45, %v12095_v58  ;;  %v12109_v47 = vand.u32 4294901760, %v101_v56  ;;  %v12111_v40 = vand.u32 4294901760, %v104_v61 }
  0x1d   :  { %10082 = vmatprep.mubr.f32.mxu0 %v315_v23  ;;  %v11092_v12 = vpack.c.bf16 %v577_v8, %v570_v25  ;;  %v12119_v16 = vand.u32 4294901760, %v107_v4  ;;  %v110_v59 = vsel %vm60_vm1, %v34_v63, 0  ;;  %v113_v1 = vsel %vm60_vm1, %v35_v5, 0 }
  0x1e   :  { %13270 = vst [vmem:[#allocation13_spill] sm:$0xff] %v12107_v10  ;;  %v13169_v26 = vand.u32 4294901760, %v12107_v10  ;;  %v12125_v45 = vsub.f32 %v101_v56, %v12109_v47  ;;  %v12128_v51 = vsub.f32 %v104_v61, %v12111_v40  ;;  %v12130_v50 = vand.u32 4294901760, %v110_v59 }
  0x1f   :  { %11093 = vmatprep.subr.bf16.mxu0 %v11092_v12  ;;  %v12133_v23 = vsub.f32 %v107_v4, %v12119_v16  ;;  %v12135_v25 = vand.u32 4294901760, %v113_v1  ;;  %v116_v63 = vsel %vm60_vm1, %v36_v62, 0  ;;  %v119_v5 = vsel %vm60_vm1, %v37_v11, 0 }
  0x20   :  { %13271 = vst [vmem:[#allocation14_spill] sm:$0xff] %v12125_v45  ;;  %13272 = vst [vmem:[#allocation15_spill] sm:$0xff] %v12128_v51  ;;  %10083 = vmatmul.mubr.f32.gmra.mrb[8].mxu0 %v325_v55  ;;  %v354_v56 = vsub.f32 %v12107_v10, %v13169_v26  ;;  %v13173_v8 = vand.u32 4294901760, %v12125_v45  ;;  %v13174_v61 = vand.u32 4294901760, %v12128_v51  ;;  %v12145_v48 = vsub.f32 %v110_v59, %v12130_v50  ;;  %v38_v26 = vld [vmem:[%s13154_s0 + $0xa0] sm:$0xff] }
  0x21   :  { %13273 = vst [vmem:[#allocation16_spill] sm:$0xff] %v12133_v23  ;;  %10085 = vmatprep.mubr.f32.mxu0 %v335_v57  ;;  %11095 = vmatpush3.bf16.msra.mxu0 %v11092_v12  ;;  %v13176_v4 = vand.u32 4294901760, %v12133_v23  ;;  %v12149_v62 = vsub.f32 %v113_v1, %v12135_v25  ;;  %v12151_v11 = vand.u32 4294901760, %v116_v63  ;;  %v12153_v55 = vand.u32 4294901760, %v119_v5 }
  0x22   :  { %13274 = vst [vmem:[#allocation17_spill] sm:$0xff] %v12145_v48  ;;  %v355_v37 = vand.u32 4294901760, %v354_v56  ;;  %v364_v59 = vsub.f32 %v12125_v45, %v13173_v8  ;;  %v374_v57 = vsub.f32 %v12128_v51, %v13174_v61  ;;  %v13183_v12 = vand.u32 4294901760, %v12145_v48  ;;  %v39_v8 = vld [vmem:[%s13154_s0 + $0xa8] sm:$0xff]  ;;  %v40_v61 = vld [vmem:[%s13154_s0 + $0xb0] sm:$0xff] }
  0x23   :  { %13275 = vst [vmem:[#allocation18_spill] sm:$0xff] %v12149_v62  ;;  %13276 = vst [vmem:[#allocation19_spill] sm:$0xff] %v12151_v11  ;;  %v384_v1 = vsub.f32 %v12133_v23, %v13176_v4  ;;  %v12170_v2 = vsub.f32 %v116_v63, %v12151_v11  ;;  %v12173_v56 = vsub.f32 %v119_v5, %v12153_v55  ;;  %v122_v63 = vsel %vm60_vm1, %v38_v26, 0 }
  0x24   :  { %13277 = vst [vmem:[#allocation20_spill] sm:$0xff] %v12153_v55  ;;  %10086 = vmatmul.mubr.f32.gmra.mrb[10].mxu0 %v345_v7  ;;  %v365_v36 = vand.u32 4294901760, %v364_v59  ;;  %v394_v4 = vsub.f32 %v12145_v48, %v13183_v12  ;;  %v375_v32 = vand.u32 4294901760, %v374_v57  ;;  %v12190_v23 = vand.u32 4294901760, %v122_v63 }
  0x25   :  { %13278 = vst [vmem:[#allocation21_spill] sm:$0xff] %v12170_v2  ;;  %13279 = vst [vmem:[#allocation22_spill] sm:$0xff] %v12173_v56  ;;  %10088 = vmatprep.mubr.f32.mxu0 %v355_v37  ;;  %v125_v7 = vsel %vm60_vm1, %v39_v8, 0  ;;  %v128_v59 = vsel %vm60_vm1, %v40_v61, 0  ;;  %v385_v51 = vand.u32 4294901760, %v384_v1  ;;  %v13281_v26 = vand.u32 4294901760, %v12149_v62 }
  0x26   :  { %13280 = vst [vmem:[#allocation23_spill] sm:$0xff] %v12190_v23  ;;  %v395_v12 = vand.u32 4294901760, %v394_v4  ;;  %v12197_v57 = vand.u32 4294901760, %v125_v7  ;;  %v12203_v5 = vsub.f32 %v122_v63, %v12190_v23  ;;  %v12205_v48 = vand.u32 4294901760, %v128_v59  ;;  %v43_v4 = vld [vmem:[%s13154_s0 + $0xc8] sm:$0xff] }
  0x27   :  { %v404_v37 = vsub.f32 %v12149_v62, %v13281_v26  ;;  %v12209_v8 = vsub.f32 %v11877_v9, %v11891_v14  ;;  %v131_v61 = vsel %vm60_vm1, %v41_v0, 0  ;;  %v13285_v1 = vand.u32 4294901760, %v12170_v2 }
  0x28   :  { %13282 = vst [vmem:[#allocation24_spill] sm:$0xff] %v12197_v57  ;;  %10089 = vmatmul.mubr.f32.gmra.mrb[12].mxu0 %v365_v36  ;;  %13283 = vst [vmem:[#allocation25_spill] sm:$0xff] %v12203_v5  ;;  %v13286_v63 = vand.u32 4294901760, %v12173_v56  ;;  %v12222_v62 = vsub.f32 %v125_v7, %v12197_v57  ;;  %v12224_v9 = vand.u32 4294901760, %v131_v61  ;;  %v12228_v45 = vsub.f32 %v128_v59, %v12205_v48 }
  0x29   :  { %13284 = vst [vmem:[#allocation26_spill] sm:$0xff] %v12205_v48  ;;  %10091 = vmatprep.mubr.f32.mxu0 %v375_v32  ;;  %v414_v36 = vsub.f32 %v12170_v2, %v13285_v1  ;;  %v12231_v32 = vand.u32 4294901760, %v12209_v8  ;;  %v134_v10 = vsel %vm60_vm1, %v42_v30, 0  ;;  %v44_v1 = vld [vmem:[%s13154_s0 + $0xd0] sm:$0xff]  ;;  %v137_v0 = vsel %vm60_vm1, %v43_v4, 0 }
  0x2a   :  { %v424_v26 = vsub.f32 %v12173_v56, %v13286_v63  ;;  %13287 = vst [vmem:[#allocation27_spill] sm:$0xff] %v12222_v62  ;;  %13288 = vst [vmem:[#allocation28_spill] sm:$0xff] %v12224_v9  ;;  %v12239_v7 = vsub.f32 %v131_v61, %v12224_v9  ;;  %v12241_v56 = vand.u32 4294901760, %v134_v10  ;;  %v405_v59 = vand.u32 4294901760, %v404_v37  ;;  %v46_v37 = vld [vmem:[%s13154_s0 + $0xe0] sm:$0xff] }
  0x2b   :  { %13289 = vst [vmem:[#allocation29_spill] sm:$0xff] %v12228_v45  ;;  %13290 = vst [vmem:[#allocation30_spill] sm:$0xff] %v12231_v32  ;;  %v583_v30 = vsub.f32 %v12209_v8, %v12231_v32  ;;  %v12247_v60 = vand.u32 4294901760, %v137_v0  ;;  %v415_v53 = vand.u32 4294901760, %v414_v36  ;;  %v13294_v63 = vand.u32 4294901760, %v12203_v5 }
  0x2c   :  { %13291 = vst [vmem:[#allocation31_spill] sm:$0xff] %v12239_v7  ;;  %13292 = vst [vmem:[#allocation32_spill] sm:$0xff] %v12241_v56  ;;  %10092 = vmatmul.mubr.f32.gmra.mrb[14].mxu0 %v385_v51  ;;  %v12253_v49 = vsub.f32 %v134_v10, %v12241_v56  ;;  %v140_v4 = vsel %vm60_vm1, %v44_v1, 0  ;;  %v45_v51 = vld [vmem:[%s13154_s0 + $0xd8] sm:$0xff]  ;;  %v425_v2 = vand.u32 4294901760, %v424_v26  ;;  %v13296_v36 = vand.u32 4294901760, %v12222_v62 }
  0x2d   :  { %13293 = vst [vmem:[#allocation33_spill] sm:$0xff] %v12247_v60  ;;  %10094 = vmatprep.mubr.f32.mxu0 %v395_v12  ;;  %v434_v61 = vsub.f32 %v12203_v5, %v13294_v63  ;;  %v584_v12 = vand.u32 4294901760, %v583_v30  ;;  %v13297_v63 = vand.u32 4294901760, %v12228_v45  ;;  %v12269_v5 = vand.u32 4294901760, %v140_v4  ;;  %v48_v26 = vld [vmem:[%s13154_s0 + $0xf0] sm:$0xff] }
  0x2e   :  { %13295 = vst [vmem:[#allocation34_spill] sm:$0xff] %v12253_v49  ;;  %v444_v32 = vsub.f32 %v12222_v62, %v13296_v36  ;;  %v12279_v36 = vsub.f32 %v137_v0, %v12247_v60  ;;  %v146_v1 = vsel %vm60_vm1, %v46_v37, 0  ;;  %v152_v30 = vsel %vm60_vm1, %v48_v26, 0  ;;  %v49_v0 = vld [vmem:[%s13154_s0 + $0xf8] sm:$0xff] }
  0x2f   :  { %v454_v10 = vsub.f32 %v12228_v45, %v13297_v63  ;;  %13298 = vst [vmem:[#allocation35_spill] sm:$0xff] %v12269_v5  ;;  %10126 = vmatprep.subr.mxu0 %v584_v12  ;;  %v143_v63 = vsel %vm60_vm1, %v45_v51, 0  ;;  %v435_v45 = vand.u32 4294901760, %v434_v61  ;;  %v12284_v62 = vsub.f32 %v140_v4, %v12269_v5 }
  0x30   :  { %10095 = vmatmul.mubr.f32.gmra.mrb[16].mxu0 %v405_v59  ;;  %13299 = vst [vmem:[#allocation36_spill] sm:$0xff] %v12279_v36  ;;  %v12286_v27 = vand.u32 4294901760, %v143_v63  ;;  %v12288_v17 = vand.u32 4294901760, %v146_v1  ;;  %v149_v59 = vsel %vm60_vm1, %v47_v44, 0  ;;  %v445_v51 = vand.u32 4294901760, %v444_v32 }
  0x31   :  { %10097 = vmatprep.mubr.f32.mxu0 %v415_v53  ;;  %10127 = vmatpush3.msra.mxu0 %v584_v12  ;;  %v455_v37 = vand.u32 4294901760, %v454_v10  ;;  %v13302_v53 = vand.u32 4294901760, %v12239_v7  ;;  %v13303_v4 = vand.u32 4294901760, %v12253_v49  ;;  %v13224_v52 = vand.u32 4294901760, %v12279_v36 }
  0x32   :  { %13300 = vst [vmem:[#allocation37_spill] sm:$0xff] %v12286_v27  ;;  %13301 = vst [vmem:[#allocation38_spill] sm:$0xff] %v12288_v17  ;;  %v12303_v44 = vsub.f32 %v143_v63, %v12286_v27  ;;  %v12305_v26 = vand.u32 4294901760, %v149_v59  ;;  %v12309_v10 = vsub.f32 %v146_v1, %v12288_v17  ;;  %v12311_v14 = vand.u32 4294901760, %v152_v30 }
  0x33   :  { %v464_v61 = vsub.f32 %v12239_v7, %v13302_v53  ;;  %v474_v12 = vsub.f32 %v12253_v49, %v13303_v4  ;;  %v11096_v53 = vpack.c.bf16 %v11917_v24, %v11911_v22  ;;  %v484_v63 = vsub.f32 %v12279_v36, %v13224_v52 }
  0x34   :  { %10098 = vmatmul.mubr.f32.gmra.mrb[18].mxu0 %v425_v2  ;;  %13304 = vst [vmem:[#allocation39_spill] sm:$0xff] %v12303_v44  ;;  %13305 = vst [vmem:[#allocation40_spill] sm:$0xff] %v12305_v26  ;;  %v155_v2 = vsel %vm60_vm1, %v49_v0, 0  ;;  %v12321_v32 = vsub.f32 %v149_v59, %v12305_v26  ;;  %v13308_v0 = vand.u32 4294901760, %v12284_v62  ;;  %vm11828_vm2 = vmmov 0  }
  0x35   :  { %10100 = vmatprep.mubr.f32.mxu0 %v435_v45  ;;  %13306 = vst [vmem:[#allocation41_spill] sm:$0xff] %v12311_v14  ;;  %v465_v4 = vand.u32 4294901760, %v464_v61  ;;  %v13227_v45 = vand.u32 4294901760, %v12303_v44  ;;  %v12323_v1 = vand.u32 4294901760, %v155_v2  ;;  %11097 = vmatprep.subr.bf16.mxu0 %v11096_v53  ;;  %v475_v49 = vand.u32 4294901760, %v474_v12 }
  0x36   :  { %v494_v7 = vsub.f32 %v12284_v62, %v13308_v0  ;;  %v12330_v61 = vsub.f32 %v152_v30, %v12311_v14  ;;  %v485_v52 = vand.u32 4294901760, %v484_v63  ;;  %v13232_v36 = vand.u32 4294901760, %v12321_v32 }
  0x37   :  { %13307 = vst [vmem:[#allocation42_spill] sm:$0xff] %v12323_v1  ;;  %v504_v59 = vsub.f32 %v12303_v44, %v13227_v45  ;;  %vm2047_vm3 = vcmask 130048   ;;  %vm9502_vm4 = vcmask 261120  }
  0x38   :  { %10101 = vmatmul.mubr.f32.gmra.mrb[20].mxu0 %v445_v51  ;;  %v13233_v51 = vand.u32 4294901760, %v12309_v10  ;;  %v495_v12 = vand.u32 4294901760, %v494_v7  ;;  %v13231_v30 = vand.u32 4294901760, %v12330_v61  ;;  %v524_v63 = vsub.f32 %v12321_v32, %v13232_v36  ;;  %v13326_v36 = vld [vmem:[#allocation22_spill] sm:$0xff] }
  0x39   :  { %10103 = vmatprep.mubr.f32.mxu0 %v455_v37  ;;  %v12337_v37 = vsub.f32 %v155_v2, %v12323_v1 }
  0x3a   :  { %v514_v0 = vsub.f32 %v12309_v10, %v13233_v51  ;;  %v525_v7 = vand.u32 4294901760, %v524_v63  ;;  %v13313_v63 = vld [vmem:[#allocation7_spill] sm:$0xff]  ;;  %v13327_v51 = vld [vmem:[#allocation25_spill] sm:$0xff] }
  0x3b   :  { %v13230_v45 = vand.u32 4294901760, %v12337_v37 }
  0x3c   :  { %10104 = vmatmul.mubr.f32.gmra.mrb[22].mxu0 %v465_v4  ;;  %v505_v4 = vand.u32 4294901760, %v504_v59  ;;  %v515_v44 = vand.u32 4294901760, %v514_v0 }
  0x3d   :  { %10106 = vmatprep.mubr.f32.mxu0 %v475_v49  ;;  %v534_v49 = vsub.f32 %v12330_v61, %v13231_v30  ;;  %v544_v2 = vsub.f32 %v12337_v37, %v13230_v45  ;;  %v13324_v45 = vld [vmem:[#allocation18_spill] sm:$0xff]  ;;  %v13325_v30 = vld [vmem:[#allocation21_spill] sm:$0xff] }
  0x3f   :  { %v545_v59 = vand.u32 4294901760, %v544_v2  ;;  %v13316_v2 = vld [vmem:[#allocation10_spill] sm:$0xff] }
  0x40   :  { %10107 = vmatmul.mubr.f32.gmra.mrb[24].mxu0 %v485_v52  ;;  %v535_v52 = vand.u32 4294901760, %v534_v49  ;;  %v13314_v49 = vld [vmem:[#allocation8_spill] sm:$0xff] }
  0x41   :  { %10109 = vmatprep.mubr.f32.mxu0 %v495_v12  ;;  %v11100_v12 = vpack.c.bf16 %v12052_v6, %v12033_v46 }
  0x44   :  { %10110 = vmatmul.mubr.f32.gmra.mrb[26].mxu0 %v505_v4  ;;  %v13312_v4 = vld [vmem:[#allocation6_spill] sm:$0xff] }
  0x45   :  { %10112 = vmatprep.mubr.f32.mxu0 %v515_v44  ;;  %v13310_v44 = vand.u32 4294901760, %v11911_v22  ;;  %v13319_v22 = vld [vmem:[#allocation13_spill] sm:$0xff] }
  0x48   :  { %10113 = vmatmul.mubr.f32.gmra.mrb[28].mxu0 %v525_v7  ;;  %v13315_v7 = vld [vmem:[#allocation9_spill] sm:$0xff] }
  0x49   :  { %10115 = vmatprep.mubr.f32.mxu0 %v535_v52  ;;  %v13317_v52 = vld [vmem:[#allocation11_spill] sm:$0xff] }
  0x4c   :  { %10116 = vmatmul.mubr.f32.gmra.mrb[30].mxu0 %v545_v59  ;;  %v13318_v59 = vld [vmem:[#allocation12_spill] sm:$0xff] }
  0x4d   :  { %10128 = vmatprep.mubr.f32.mxu0 %v11907_v20 }
  0x50   :  { %10129 = vmatmul.mubr.f32.vlgmr.msra.gmra.mrb[0].mxu0 %v11909_v21 }
  0x51   :  { %11099 = vmatpush3.bf16.msra.mxu0 %v11096_v53  ;;  %10131 = vmatprep.mubr.f32.mxu0 %v11930_v31  ;;  %v13311_v53 = vand.u32 4294901760, %v11917_v24  ;;  %v13320_v24 = vld [vmem:[#allocation14_spill] sm:$0xff] }
  0x52   :  { %11101 = vmatprep.subr.bf16.mxu0 %v11100_v12 }
  0x53   :  { %v11112_v0 = vpack.c.bf16 %v13311_v53, %v13310_v44  ;;  %v13322_v44 = vld [vmem:[#allocation16_spill] sm:$0xff]  ;;  %v13323_v53 = vld [vmem:[#allocation17_spill] sm:$0xff] }
  0x54   :  { %10132 = vmatmul.mubr.f32.gmra.mrb[2].mxu0 %v11934_v33 }
  0x55   :  { %10134 = vmatprep.mubr.f32.mxu0 %v11936_v34  ;;  %11103 = vmatpush3.bf16.msra.mxu0 %v11100_v12  ;;  %v13321_v12 = vld [vmem:[#allocation15_spill] sm:$0xff] }
  0x56   :  { %10184 = vmatprep.subr.mxu0 %v12209_v8 }
  0x58   :  { %10135 = vmatmul.mubr.f32.gmra.mrb[4].mxu0 %v11956_v43 }
  0x59   :  { %10137 = vmatprep.mubr.f32.mxu0 %v11999_v3  ;;  %10185 = vmatpush3.msra.mxu0 %v12209_v8  ;;  %v13309_v8 = vld [vmem:[#allocation5_spill] sm:$0xff] }
  0x5a   :  { %11105 = vmatprep.subr.bf16.mxu0 %v11888_v13 }
  0x5c   :  { %10138 = vmatmul.mubr.f32.gmra.mrb[6].mxu0 %v12006_v15 }
  0x5d   :  { %10140 = vmatprep.mubr.f32.mxu0 %v12014_v18 }
  0x60   :  { %10141 = vmatmul.mubr.f32.gmra.mrb[8].mxu0 %v12021_v35 }
  0x61   :  { %10143 = vmatprep.mubr.f32.mxu0 %v12023_v38 }
  0x64   :  { %10144 = vmatmul.mubr.f32.gmra.mrb[10].mxu0 %v12042_v54 }
  0x65   :  { %10146 = vmatprep.mubr.f32.mxu0 %v12095_v58 }
  0x68   :  { %10147 = vmatmul.mubr.f32.gmra.mrb[12].mxu0 %v12109_v47 }
  0x69   :  { %10149 = vmatprep.mubr.f32.mxu0 %v12111_v40 }
  0x6c   :  { %10150 = vmatmul.mubr.f32.gmra.mrb[14].mxu0 %v12119_v16 }
  0x6d   :  { %10152 = vmatprep.mubr.f32.mxu0 %v12130_v50 }
  0x70   :  { %10153 = vmatmul.mubr.f32.gmra.mrb[16].mxu0 %v12135_v25 }
  0x71   :  { %10155 = vmatprep.mubr.f32.mxu0 %v12151_v11  ;;  %v13340_v11 = vand.u32 4294901760, %v11954_v42 }
  0x74   :  { %10156 = vmatmul.mubr.f32.gmra.mrb[18].mxu0 %v12153_v55  ;;  %v13339_v55 = vand.u32 4294901760, %v11951_v41 }
  0x75   :  { %10158 = vmatprep.mubr.f32.mxu0 %v12190_v23  ;;  %v13338_v23 = vand.u32 4294901760, %v11945_v39 }
  0x78   :  { %10159 = vmatmul.mubr.f32.gmra.mrb[20].mxu0 %v12197_v57  ;;  %v13337_v57 = vand.u32 4294901760, %v11927_v29 }
  0x79   :  { %10161 = vmatprep.mubr.f32.mxu0 %v12205_v48 }
  0x7c   :  { %10162 = vmatmul.mubr.f32.gmra.mrb[22].mxu0 %v12224_v9  ;;  %v13336_v9 = vand.u32 4294901760, %v12052_v6  ;;  %v13348_v6 = vand.u32 4294901760, %v13318_v59 }
  0x7d   :  { %10164 = vmatprep.mubr.f32.mxu0 %v12241_v56  ;;  %v13335_v56 = vand.u32 4294901760, %v12033_v46  ;;  %v13342_v46 = vand.u32 4294901760, %v13312_v4 }
  0x7f   :  { %v11116_v48 = vpack.c.bf16 %v13336_v9, %v13335_v56  ;;  %v13353_v56 = vand.u32 4294901760, %v13323_v53  ;;  %v13355_v9 = vand.u32 4294901760, %v13325_v30 }
  0x80   :  { %10165 = vmatmul.mubr.f32.gmra.mrb[24].mxu0 %v12247_v60  ;;  %v13334_v60 = vand.u32 4294901760, %v11924_v28 }
  0x81   :  { %10167 = vmatprep.mubr.f32.mxu0 %v12269_v5  ;;  %v13333_v5 = vld [vmem:[#allocation39_spill] sm:$0xff] }
  0x84   :  { %10168 = vmatmul.mubr.f32.gmra.mrb[26].mxu0 %v12286_v27  ;;  %v13332_v27 = vld [vmem:[#allocation36_spill] sm:$0xff] }
  0x85   :  { %10170 = vmatprep.mubr.f32.mxu0 %v12288_v17  ;;  %v13331_v17 = vld [vmem:[#allocation34_spill] sm:$0xff] }
  0x88   :  { %10171 = vmatmul.mubr.f32.gmra.mrb[28].mxu0 %v12305_v26  ;;  %v13330_v26 = vld [vmem:[#allocation31_spill] sm:$0xff] }
  0x89   :  { %10173 = vmatprep.mubr.f32.mxu0 %v12311_v14  ;;  %v13329_v14 = vld [vmem:[#allocation29_spill] sm:$0xff] }
  0x8c   :  { %10174 = vmatmul.mubr.f32.gmra.mrb[30].mxu0 %v12323_v1  ;;  %v13328_v1 = vld [vmem:[#allocation27_spill] sm:$0xff] }
  0x8d   :  { %10186 = vmatprep.mubr.f32.mxu0 %v11924_v28  ;;  %v13341_v28 = vld [vmem:[#allocation30_spill] sm:$0xff] }
  0x90   :  { %10187 = vmatmul.mubr.f32.vlgmr.msra.gmra.mrb[0].mxu0 %v11927_v29  ;;  %v13343_v29 = vand.u32 4294901760, %v13313_v63 }
  0x91   :  { %11107 = vmatpush3.bf16.msra.mxu0 %v11888_v13  ;;  %10189 = vmatprep.mubr.f32.mxu0 %v11945_v39  ;;  %v13344_v39 = vand.u32 4294901760, %v13314_v49 }
  0x92   :  { %11109 = vmatprep.subr.bf16.mxu0 %v11905_v19 }
  0x94   :  { %10190 = vmatmul.mubr.f32.gmra.mrb[2].mxu0 %v11951_v41  ;;  %v13345_v41 = vand.u32 4294901760, %v13315_v7 }
  0x95   :  { %10192 = vmatprep.mubr.f32.mxu0 %v11954_v42  ;;  %11111 = vmatpush3.bf16.msra.mxu0 %v11905_v19  ;;  %v13346_v42 = vand.u32 4294901760, %v13316_v2 }
  0x96   :  { %10242 = vmatprep.subr.mxu0 %v13309_v8 }
  0x98   :  { %10193 = vmatmul.mubr.f32.gmra.mrb[4].mxu0 %v13312_v4  ;;  %v13357_v4 = vand.u32 4294901760, %v13327_v51 }
  0x99   :  { %10195 = vmatprep.mubr.f32.mxu0 %v13313_v63  ;;  %10243 = vmatpush3.msra.mxu0 %v13309_v8  ;;  %v13358_v63 = vand.u32 4294901760, %v13328_v1 }
  0x9a   :  { %11113 = vmatprep.subr.bf16.mxu0 %v11112_v0 }
  0x9c   :  { %10196 = vmatmul.mubr.f32.gmra.mrb[6].mxu0 %v13314_v49  ;;  %v13359_v49 = vand.u32 4294901760, %v13329_v14 }
  0x9d   :  { %10198 = vmatprep.mubr.f32.mxu0 %v13315_v7  ;;  %v13360_v7 = vand.u32 4294901760, %v13330_v26 }
  0xa0   :  { %10199 = vmatmul.mubr.f32.gmra.mrb[8].mxu0 %v13316_v2  ;;  %v13379_v2 = vld [vmem:[#allocation38_spill] sm:$0xff] }
  0xa1   :  { %10201 = vmatprep.mubr.f32.mxu0 %v13317_v52 }
  0xa4   :  { %10202 = vmatmul.mubr.f32.gmra.mrb[10].mxu0 %v13318_v59  ;;  %v13381_v59 = vld [vmem:[#allocation41_spill] sm:$0xff] }
  0xa5   :  { %10204 = vmatprep.mubr.f32.mxu0 %v13319_v22 }
  0xa8   :  { %10205 = vmatmul.mubr.f32.gmra.mrb[12].mxu0 %v13320_v24 }
  0xa9   :  { %10207 = vmatprep.mubr.f32.mxu0 %v13321_v12 }
  0xac   :  { %10208 = vmatmul.mubr.f32.gmra.mrb[14].mxu0 %v13322_v44 }
  0xad   :  { %10210 = vmatprep.mubr.f32.mxu0 %v13323_v53 }
  0xb0   :  { %10211 = vmatmul.mubr.f32.gmra.mrb[16].mxu0 %v13324_v45 }
  0xb1   :  { %10213 = vmatprep.mubr.f32.mxu0 %v13325_v30  ;;  %v13362_v30 = vand.u32 4294901760, %v13332_v27 }
  0xb4   :  { %10214 = vmatmul.mubr.f32.gmra.mrb[18].mxu0 %v13326_v36 }
  0xb5   :  { %10216 = vmatprep.mubr.f32.mxu0 %v13327_v51  ;;  %v13364_v51 = vand.u32 4294901760, %v13333_v5 }
  0xb8   :  { %10217 = vmatmul.mubr.f32.gmra.mrb[20].mxu0 %v13328_v1  ;;  %v13365_v1 = vand.u32 4294901760, %v12309_v10 }
  0xb9   :  { %10219 = vmatprep.mubr.f32.mxu0 %v13329_v14  ;;  %v13366_v14 = vand.u32 4294901760, %v12321_v32 }
  0xbc   :  { %10220 = vmatmul.mubr.f32.gmra.mrb[22].mxu0 %v13330_v26  ;;  %v13367_v26 = vand.u32 4294901760, %v12330_v61 }
  0xbd   :  { %10222 = vmatprep.mubr.f32.mxu0 %v13331_v17 }
  0xc0   :  { %10223 = vmatmul.mubr.f32.gmra.mrb[24].mxu0 %v13332_v27  ;;  %v13371_v27 = vld [vmem:[#allocation23_spill] sm:$0xff] }
  0xc1   :  { %10225 = vmatprep.mubr.f32.mxu0 %v12284_v62 }
  0xc4   :  { %10226 = vmatmul.mubr.f32.gmra.mrb[26].mxu0 %v13333_v5  ;;  %v13373_v5 = vld [vmem:[#allocation26_spill] sm:$0xff] }
  0xc5   :  { %10228 = vmatprep.mubr.f32.mxu0 %v12309_v10  ;;  %v13375_v10 = vld [vmem:[#allocation32_spill] sm:$0xff] }
  0xc8   :  { %10229 = vmatmul.mubr.f32.gmra.mrb[28].mxu0 %v12321_v32  ;;  %v13374_v32 = vld [vmem:[#allocation28_spill] sm:$0xff] }
  0xc9   :  { %10231 = vmatprep.mubr.f32.mxu0 %v12330_v61  ;;  %v13376_v61 = vld [vmem:[#allocation33_spill] sm:$0xff] }
  0xcc   :  { %10232 = vmatmul.mubr.f32.gmra.mrb[30].mxu0 %v12337_v37 }
  0xcd   :  { %10244 = vmatprep.mubr.f32.mxu0 %v13334_v60  ;;  %v13349_v60 = vand.u32 4294901760, %v13319_v22  ;;  %v13382_v22 = vld [vmem:[#allocation42_spill] sm:$0xff] }
  0xd0   :  { %10245 = vmatmul.mubr.f32.vlgmr.msra.gmra.mrb[0].mxu0 %v13337_v57  ;;  %v13354_v57 = vand.u32 4294901760, %v13324_v45  ;;  %v13361_v45 = vand.u32 4294901760, %v13331_v17  ;;  %v13368_v17 = vand.u32 4294901760, %v12337_v37  ;;  %v13377_v37 = vld [vmem:[#allocation35_spill] sm:$0xff] }
  0xd1   :  { %11115 = vmatpush3.bf16.msra.mxu0 %v11112_v0  ;;  %10247 = vmatprep.mubr.f32.mxu0 %v13338_v23  ;;  %v13350_v23 = vand.u32 4294901760, %v13320_v24  ;;  %v13356_v0 = vand.u32 4294901760, %v13326_v36  ;;  %v13363_v36 = vand.u32 4294901760, %v12284_v62  ;;  %v13372_v62 = vld [vmem:[#allocation24_spill] sm:$0xff] }
  0xd2   :  { %11117 = vmatprep.subr.bf16.mxu0 %v11116_v48 }
  0xd4   :  { %10248 = vmatmul.mubr.f32.gmra.mrb[2].mxu0 %v13339_v55  ;;  %v13352_v55 = vand.u32 4294901760, %v13322_v44  ;;  %v12601_v44 = vld [vmem:[%s13157_s3] ss:$0 sm:$0xff] }
  0xd5   :  { %10250 = vmatprep.mubr.f32.mxu0 %v13340_v11  ;;  %11119 = vmatpush3.bf16.msra.mxu0 %v11116_v48  ;;  %v13347_v48 = vand.u32 4294901760, %v13317_v52  ;;  %v13351_v11 = vand.u32 4294901760, %v13321_v12  ;;  %v13380_v52 = vld [vmem:[#allocation40_spill] sm:$0xff] }
  0xd6   :  { %10300 = vmatprep.subr.mxu0 %v13341_v28 }
  0xd8   :  { %10251 = vmatmul.mubr.f32.gmra.mrb[4].mxu0 %v13342_v46 }
  0xd9   :  { %10253 = vmatprep.mubr.f32.mxu0 %v13343_v29  ;;  %10301 = vmatpush3.msra.mxu0 %v13341_v28 }
  0xda   :  { %11121 = vmatprep.subr.bf16.mxu0 %v11888_v13 }
  0xdc   :  { %10254 = vmatmul.mubr.f32.gmra.mrb[6].mxu0 %v13344_v39 }
  0xdd   :  { %10256 = vmatprep.mubr.f32.mxu0 %v13345_v41 }
  0xe0   :  { %10257 = vmatmul.mubr.f32.gmra.mrb[8].mxu0 %v13346_v42 }
  0xe1   :  { %10259 = vmatprep.mubr.f32.mxu0 %v13347_v48 }
  0xe4   :  { %10260 = vmatmul.mubr.f32.gmra.mrb[10].mxu0 %v13348_v6 }
  0xe5   :  { %10262 = vmatprep.mubr.f32.mxu0 %v13349_v60 }
  0xe8   :  { %10263 = vmatmul.mubr.f32.gmra.mrb[12].mxu0 %v13350_v23 }
  0xe9   :  { %10265 = vmatprep.mubr.f32.mxu0 %v13351_v11 }
  0xec   :  { %10266 = vmatmul.mubr.f32.gmra.mrb[14].mxu0 %v13352_v55 }
  0xed   :  { %10268 = vmatprep.mubr.f32.mxu0 %v13353_v56 }
  0xf0   :  { %10269 = vmatmul.mubr.f32.gmra.mrb[16].mxu0 %v13354_v57 }
  0xf1   :  { %10271 = vmatprep.mubr.f32.mxu0 %v13355_v9 }
  0xf4   :  { %10272 = vmatmul.mubr.f32.gmra.mrb[18].mxu0 %v13356_v0 }
  0xf5   :  { %10274 = vmatprep.mubr.f32.mxu0 %v13357_v4 }
  0xf8   :  { %10275 = vmatmul.mubr.f32.gmra.mrb[20].mxu0 %v13358_v63 }
  0xf9   :  { %10277 = vmatprep.mubr.f32.mxu0 %v13359_v49 }
  0xfc   :  { %10278 = vmatmul.mubr.f32.gmra.mrb[22].mxu0 %v13360_v7 }
  0xfd   :  { %10280 = vmatprep.mubr.f32.mxu0 %v13361_v45 }
 0x100   :  { %10281 = vmatmul.mubr.f32.gmra.mrb[24].mxu0 %v13362_v30 }
 0x101   :  { %10283 = vmatprep.mubr.f32.mxu0 %v13363_v36 }
 0x104   :  { %10284 = vmatmul.mubr.f32.gmra.mrb[26].mxu0 %v13364_v51 }
 0x105   :  { %10286 = vmatprep.mubr.f32.mxu0 %v13365_v1 }
 0x108   :  { %10287 = vmatmul.mubr.f32.gmra.mrb[28].mxu0 %v13366_v14 }
 0x109   :  { %10289 = vmatprep.mubr.f32.mxu0 %v13367_v26 }
 0x10c   :  { %10290 = vmatmul.mubr.f32.gmra.mrb[30].mxu0 %v13368_v17 }
 0x10d   :  { %10302 = vmatprep.mubr.f32.mxu0 %v11907_v20 }
 0x110   :  { %10303 = vmatmul.mubr.f32.vlgmr.msra.gmra.mrb[0].mxu0 %v11909_v21 }
 0x111   :  { %11123 = vmatpush3.bf16.msra.mxu0 %v11888_v13  ;;  %10305 = vmatprep.mubr.f32.mxu0 %v11930_v31  ;;  %v13369_v13 = vld [vmem:[#allocation19_spill] sm:$0xff] }
 0x112   :  { %11125 = vmatprep.subr.bf16.mxu0 %v11905_v19 }
 0x114   :  { %10306 = vmatmul.mubr.f32.gmra.mrb[2].mxu0 %v11934_v33 }
 0x115   :  { %10308 = vmatprep.mubr.f32.mxu0 %v11936_v34  ;;  %11127 = vmatpush3.bf16.msra.mxu0 %v11905_v19  ;;  %v13370_v19 = vld [vmem:[#allocation20_spill] sm:$0xff] }
 0x116   :  { %10358 = vmatprep.subr.mxu0 %v13309_v8 }
 0x118   :  { %10309 = vmatmul.mubr.f32.gmra.mrb[4].mxu0 %v11956_v43 }
 0x119   :  { %10311 = vmatprep.mubr.f32.mxu0 %v11999_v3  ;;  %10359 = vmatpush3.msra.mxu0 %v13309_v8  ;;  %v13378_v8 = vld [vmem:[#allocation37_spill] sm:$0xff] }
 0x11c   :  { %10312 = vmatmul.mubr.f32.gmra.mrb[6].mxu0 %v12006_v15 }
 0x11d   :  { %10314 = vmatprep.mubr.f32.mxu0 %v12014_v18 }
 0x120   :  { %10315 = vmatmul.mubr.f32.gmra.mrb[8].mxu0 %v12021_v35 }
 0x121   :  { %10317 = vmatprep.mubr.f32.mxu0 %v12023_v38 }
 0x124   :  { %10318 = vmatmul.mubr.f32.gmra.mrb[10].mxu0 %v12042_v54 }
 0x125   :  { %10320 = vmatprep.mubr.f32.mxu0 %v12095_v58 }
 0x128   :  { %10321 = vmatmul.mubr.f32.gmra.mrb[12].mxu0 %v12109_v47 }
 0x129   :  { %10323 = vmatprep.mubr.f32.mxu0 %v12111_v40 }
 0x12c   :  { %10324 = vmatmul.mubr.f32.gmra.mrb[14].mxu0 %v12119_v16 }
 0x12d   :  { %10326 = vmatprep.mubr.f32.mxu0 %v12130_v50 }
 0x130   :  { %10327 = vmatmul.mubr.f32.gmra.mrb[16].mxu0 %v12135_v25 }
 0x131   :  { %10329 = vmatprep.mubr.f32.mxu0 %v13369_v13 }
 0x134   :  { %10330 = vmatmul.mubr.f32.gmra.mrb[18].mxu0 %v13370_v19 }
 0x135   :  { %10332 = vmatprep.mubr.f32.mxu0 %v13371_v27 }
 0x138   :  { %10333 = vmatmul.mubr.f32.gmra.mrb[20].mxu0 %v13372_v62 }
 0x139   :  { %10335 = vmatprep.mubr.f32.mxu0 %v13373_v5 }
 0x13c   :  { %10336 = vmatmul.mubr.f32.gmra.mrb[22].mxu0 %v13374_v32 }
 0x13d   :  { %10338 = vmatprep.mubr.f32.mxu0 %v13375_v10 }
 0x140   :  { %10339 = vmatmul.mubr.f32.gmra.mrb[24].mxu0 %v13376_v61 }
 0x141   :  { %10341 = vmatprep.mubr.f32.mxu0 %v13377_v37 }
 0x144   :  { %10342 = vmatmul.mubr.f32.gmra.mrb[26].mxu0 %v13378_v8 }
 0x145   :  { %10344 = vmatprep.mubr.f32.mxu0 %v13379_v2 }
 0x148   :  { %10345 = vmatmul.mubr.f32.gmra.mrb[28].mxu0 %v13380_v52 }
 0x149   :  { %10347 = vmatprep.mubr.f32.mxu0 %v13381_v59 }
 0x14c   :  { %10348 = vmatmul.mubr.f32.gmra.mrb[30].mxu0 %v13382_v22 }
 0x14d   :  { %10360 = vmatprep.mubr.f32.mxu0 %v11907_v20  ;;  %v2045_v20 = vld [vmem:[%s13156_s2] sm:$0xff] }
 0x150   :  { %10361 = vmatmul.mubr.f32.vlgmr.msra.gmra.mrb[0].mxu0 %v11909_v21  ;;  %v2046_v21 = vld [vmem:[%s13156_s2 + $0x8] sm:$0xff] }
 0x151   :  { %10363 = vmatprep.mubr.f32.mxu0 %v11930_v31  ;;  %v2052_v31 = vand.u32 4294901760, %v2045_v20 }
 0x154   :  { %10364 = vmatmul.mubr.f32.gmra.mrb[2].mxu0 %v11934_v33  ;;  %v2055_v33 = vand.u32 4294901760, %v2046_v21 }
 0x155   :  { %10366 = vmatprep.mubr.f32.mxu0 %v11936_v34 }
 0x156   :  { %v12577_v34 = vpack.c.bf16 %v2055_v33, %v2052_v31 }
 0x158   :  { %10367 = vmatmul.mubr.f32.gmra.mrb[4].mxu0 %v11956_v43  ;;  %v12579_v43 = vsub.f32 %v2045_v20, %v2052_v31 }
 0x159   :  { %10369 = vmatprep.mubr.f32.mxu0 %v11999_v3  ;;  %v11827_v3 = vmov 0.0|0.0  }
 0x15a   :  { %11128 = vmatprep.subr.bf16.mxu1 %v11827_v3 }
 0x15b   :  { %11130 = vmatpush3.bf16.msra.mxu1 %v12577_v34 }
 0x15c   :  { %10370 = vmatmul.mubr.f32.gmra.mrb[6].mxu0 %v12006_v15  ;;  %v2131_v15 = vand.u32 4294901760, %v12579_v43  ;;  %11131 = vmatprep.subr.bf16.mxu1 %v11827_v3 }
 0x15d   :  { %10372 = vmatprep.mubr.f32.mxu0 %v12014_v18 }
 0x160   :  { %10373 = vmatmul.mubr.f32.gmra.mrb[8].mxu0 %v12021_v35  ;;  %v11829_v35 = vmov 0.0  }
 0x161   :  { %10375 = vmatprep.mubr.f32.mxu0 %v12023_v38  ;;  %10412 = vmatprep.mubr.msk.f32.mxu1 %vm11828_vm2, %v11829_v35  ;;  %v2132_v38 = vsub.f32 %v12579_v43, %v2131_v15 }
 0x164   :  { %10376 = vmatmul.mubr.f32.gmra.mrb[10].mxu0 %v12042_v54 }
 0x165   :  { %10378 = vmatprep.mubr.f32.mxu0 %v12095_v58 }
 0x168   :  { %10379 = vmatmul.mubr.f32.gmra.mrb[12].mxu0 %v12109_v47  ;;  %v2133_v47 = vand.u32 4294901760, %v2132_v38 }
 0x169   :  { %10381 = vmatprep.mubr.f32.mxu0 %v12111_v40 }
 0x16c   :  { %10382 = vmatmul.mubr.f32.gmra.mrb[14].mxu0 %v12119_v16 }
 0x16d   :  { %10384 = vmatprep.mubr.f32.mxu0 %v12130_v50  ;;  %v12581_v50 = vsub.f32 %v2046_v21, %v2055_v33 }
 0x16f   :  { %v2138_v18 = vand.u32 4294901760, %v12581_v50  ;;  %v11135_v16 = vpack.c.bf16 %v12581_v50, %v12579_v43 }
 0x170   :  { %10385 = vmatmul.mubr.f32.gmra.mrb[16].mxu0 %v12135_v25 }
 0x171   :  { %10387 = vmatprep.mubr.f32.mxu0 %v13369_v13  ;;  %v2139_v40 = vsub.f32 %v12581_v50, %v2138_v18  ;;  %v12596_v25 = vpack.c.bf16 %v2138_v18, %v2131_v15 }
 0x173   :  { %v2140_v54 = vand.u32 4294901760, %v2139_v40 }
 0x174   :  { %10388 = vmatmul.mubr.f32.gmra.mrb[18].mxu0 %v13370_v19 }
 0x175   :  { %10390 = vmatprep.mubr.f32.mxu0 %v13371_v27  ;;  %v12592_v58 = vpack.c.bf16 %v2140_v54, %v2133_v47 }
 0x178   :  { %10391 = vmatmul.mubr.f32.gmra.mrb[20].mxu0 %v13372_v62 }
 0x179   :  { %10393 = vmatprep.mubr.f32.mxu0 %v13373_v5 }
 0x17c   :  { %10394 = vmatmul.mubr.f32.gmra.mrb[22].mxu0 %v13374_v32 }
 0x17d   :  { %10396 = vmatprep.mubr.f32.mxu0 %v13375_v10 }
 0x180   :  { %10397 = vmatmul.mubr.f32.gmra.mrb[24].mxu0 %v13376_v61 }
 0x181   :  { %10399 = vmatprep.mubr.f32.mxu0 %v13377_v37 }
 0x184   :  { %10400 = vmatmul.mubr.f32.gmra.mrb[26].mxu0 %v13378_v8 }
 0x185   :  { %10402 = vmatprep.mubr.f32.mxu0 %v13379_v2 }
 0x188   :  { %10403 = vmatmul.mubr.f32.gmra.mrb[28].mxu0 %v13380_v52 }
 0x189   :  { %10405 = vmatprep.mubr.f32.mxu0 %v13381_v59 }
 0x18c   :  { %10406 = vmatmul.mubr.f32.gmra.mrb[30].mxu0 %v13382_v22 }
 0x223   :  { %v10362_v24 = vpop.f32.mrb[0].mxu0 }
 0x224   :  { %v1802_v12 = vpop.f32.mrb[1].mxu0  ;;  %v11416_v17 = vadd.f32 %v10362_v24, %v12601_v44 }
 0x225   :  { %v11417_v13 = vadd.f32 %v12601_v44, %v1802_v12 }
 0x226   :  { %v1993_v32 = vmax.f32 %v11416_v17, 0.0 }
 0x227   :  { %v10365_v53 = vpop.f32.mrb[2].mxu0  ;;  %v1992_v61 = vmax.f32 %v11417_v13, 0.0 }
 0x228   :  { %v11418_v28 = vadd.f32 %v10365_v53, %v12601_v44  ;;  %v1814_v46 = vpop.f32.mrb[3].mxu0 }
 0x229   :  { %v11419_v29 = vadd.f32 %v12601_v44, %v1814_v46 }
 0x22a   :  { %v1995_v21 = vmax.f32 %v11418_v28, 0.0 }
 0x22b   :  { %v10368_v39 = vpop.f32.mrb[4].mxu0  ;;  %v1994_v33 = vmax.f32 %v11419_v29, 0.0 }
 0x22c   :  { %v11420_v41 = vadd.f32 %v10368_v39, %v12601_v44  ;;  %v1826_v42 = vpop.f32.mrb[5].mxu0 }
 0x22d   :  { %v12607_v48 = vadd.f32 %v12601_v44, %v1826_v42 }
 0x22e   :  { %v1997_v46 = vmax.f32 %v11420_v41, 0.0 }
 0x22f   :  { %v10371_v6 = vpop.f32.mrb[6].mxu0  ;;  %v1996_v42 = vmax.f32 %v12607_v48, 0.0 }
 0x230   :  { %v12610_v60 = vadd.f32 %v10371_v6, %v12601_v44  ;;  %v1838_v23 = vpop.f32.mrb[7].mxu0 }
 0x231   :  { %v12613_v11 = vadd.f32 %v12601_v44, %v1838_v23 }
 0x233   :  { %v10374_v55 = vpop.f32.mrb[8].mxu0  ;;  %v1998_v13 = vmax.f32 %v12613_v11, 0.0 }
 0x234   :  { %v12616_v56 = vadd.f32 %v10374_v55, %v12601_v44  ;;  %v1850_v57 = vpop.f32.mrb[9].mxu0 }
 0x235   :  { %v12619_v9 = vadd.f32 %v12601_v44, %v1850_v57 }
 0x237   :  { %v10377_v0 = vpop.f32.mrb[10].mxu0  ;;  %v2000_v11 = vmax.f32 %v12619_v9, 0.0 }
 0x238   :  { %v12622_v4 = vadd.f32 %v10377_v0, %v12601_v44  ;;  %v1862_v63 = vpop.f32.mrb[11].mxu0 }
 0x239   :  { %v12625_v49 = vadd.f32 %v12601_v44, %v1862_v63 }
 0x23a   :  { %v2003_v9 = vmax.f32 %v12622_v4, 0.0 }
 0x23b   :  { %v10380_v7 = vpop.f32.mrb[12].mxu0 }
 0x23c   :  { %v12628_v45 = vadd.f32 %v10380_v7, %v12601_v44  ;;  %v1874_v30 = vpop.f32.mrb[13].mxu0 }
 0x23d   :  { %v12631_v36 = vadd.f32 %v12601_v44, %v1874_v30 }
 0x23e   :  { %v2005_v4 = vmax.f32 %v12628_v45, 0.0 }
 0x23f   :  { %v10383_v51 = vpop.f32.mrb[14].mxu0 }
 0x240   :  { %v12634_v1 = vadd.f32 %v10383_v51, %v12601_v44  ;;  %v1886_v14 = vpop.f32.mrb[15].mxu0  ;;  %v1999_v51 = vmax.f32 %v12610_v60, 0.0 }
 0x241   :  { %v12637_v26 = vadd.f32 %v12601_v44, %v1886_v14 }
 0x243   :  { %v10386_v19 = vpop.f32.mrb[16].mxu0  ;;  %v2006_v43 = vmax.f32 %v12637_v26, 0.0  ;;  %v9521_v26 = vld [vmem:[%s13156_s2 + $0x18] sm:$0xff] }
 0x244   :  { %v11432_v27 = vadd.f32 %v10386_v19, %v12601_v44  ;;  %v1898_v62 = vpop.f32.mrb[17].mxu0 }
 0x245   :  { %v11433_v5 = vadd.f32 %v12601_v44, %v1898_v62 }
 0x246   :  { %v2009_v10 = vmax.f32 %v11432_v27, 0.0 }
 0x247   :  { %v2008_v37 = vmax.f32 %v11433_v5, 0.0  ;;  %v10389_v8 = vpop.f32.mrb[18].mxu0 }
 0x248   :  { %v12643_v2 = vmax.f32 %v1993_v32, %v2009_v10  ;;  %v11434_v52 = vadd.f32 %v10389_v8, %v12601_v44  ;;  %v1910_v59 = vpop.f32.mrb[19].mxu0  ;;  %v2001_v8 = vmax.f32 %v12616_v56, 0.0 }
 0x249   :  { %v2024_v22 = vmax.f32 %v1992_v61, %v2008_v37  ;;  %v11435_v20 = vadd.f32 %v12601_v44, %v1910_v59 }
 0x24a   :  { %v2011_v31 = vmax.f32 %v11434_v52, 0.0 }
 0x24b   :  { %v2049_v15 = vsel %vm2047_vm3, %v2024_v22, 0  ;;  %v2010_v18 = vmax.f32 %v11435_v20, 0.0  ;;  %v10392_v38 = vpop.f32.mrb[20].mxu0 }
 0x24c   :  { %v12648_v40 = vand.u32 4294901760, %v2049_v15  ;;  %v2027_v47 = vmax.f32 %v1995_v21, %v2011_v31  ;;  %v11436_v54 = vadd.f32 %v10392_v38, %v12601_v44  ;;  %v1922_v24 = vpop.f32.mrb[21].mxu0 }
 0x24d   :  { %v2026_v12 = vmax.f32 %v1994_v33, %v2010_v18  ;;  %v11437_v53 = vadd.f32 %v12601_v44, %v1922_v24 }
 0x24e   :  { %v12653_v39 = vsub.f32 %v2049_v15, %v12648_v40  ;;  %v12656_v28 = vsel %vm2047_vm3, %v2027_v47, 0  ;;  %v2013_v29 = vmax.f32 %v11436_v54, 0.0 }
 0x24f   :  { %v12660_v6 = vsel %vm2047_vm3, %v2026_v12, 0  ;;  %v2012_v23 = vmax.f32 %v11437_v53, 0.0  ;;  %v10395_v55 = vpop.f32.mrb[22].mxu0 }
 0x250   :  { %v2029_v57 = vmax.f32 %v1997_v46, %v2013_v29  ;;  %v11438_v0 = vadd.f32 %v10395_v55, %v12601_v44  ;;  %v1934_v63 = vpop.f32.mrb[23].mxu0  ;;  %v2120_v41 = vand.u32 4294901760, %v12653_v39 }
 0x251   :  { %v2028_v7 = vmax.f32 %v1996_v42, %v2012_v23  ;;  %v11439_v30 = vadd.f32 %v12601_v44, %v1934_v63 }
 0x252   :  { %v12667_v14 = vsel %vm2047_vm3, %v2029_v57, 0  ;;  %v2015_v48 = vmax.f32 %v11438_v0, 0.0  ;;  %v2121_v17 = vsub.f32 %v12653_v39, %v2120_v41 }
 0x253   :  { %v12674_v19 = vsel %vm2047_vm3, %v2028_v7, 0  ;;  %v2014_v27 = vmax.f32 %v11439_v30, 0.0  ;;  %v10398_v62 = vpop.f32.mrb[24].mxu0 }
 0x254   :  { %v2031_v5 = vmax.f32 %v1999_v51, %v2015_v48  ;;  %v11440_v32 = vadd.f32 %v10398_v62, %v12601_v44  ;;  %v1946_v10 = vpop.f32.mrb[25].mxu0  ;;  %v2122_v60 = vand.u32 4294901760, %v2121_v17  ;;  %v2007_v17 = vmax.f32 %v12634_v1, 0.0  ;;  %v9520_v1 = vld [vmem:[%s13156_s2 + $0x10] sm:$0xff] }
 0x255   :  { %v2030_v61 = vmax.f32 %v1998_v13, %v2014_v27  ;;  %v11441_v37 = vadd.f32 %v12601_v44, %v1946_v10  ;;  %v2518_v10 = vand.u32 4294901760, %v9520_v1 }
 0x256   :  { %v12680_v52 = vsel %vm2047_vm3, %v2031_v5, 0  ;;  %v2017_v59 = vmax.f32 %v11440_v32, 0.0  ;;  %10413 = vmatmul.mubr.f32.vlgmr.msra.gmra.mrb[0].mxu1 %v2122_v60  ;;  %v2521_v60 = vand.u32 4294901760, %v9521_v26 }
 0x257   :  { %v12684_v22 = vsel %vm2047_vm3, %v2030_v61, 0  ;;  %v2016_v20 = vmax.f32 %v11441_v37, 0.0  ;;  %v10401_v21 = vpop.f32.mrb[26].mxu0  ;;  %11133 = vmatpush3.bf16.msra.mxu1 %v12592_v58  ;;  %10419 = vmatprep.mubr.msk.f32.mxu1 %vm11828_vm2, %v11829_v35  ;;  %v2002_v58 = vmax.f32 %v12625_v49, 0.0  ;;  %v2004_v49 = vmax.f32 %v12631_v36, 0.0 }
 0x258   :  { %v2033_v31 = vmax.f32 %v2001_v8, %v2017_v59  ;;  %v11442_v56 = vadd.f32 %v10401_v21, %v12601_v44  ;;  %v1958_v33 = vpop.f32.mrb[27].mxu0  ;;  %11134 = vmatprep.subr.bf16.mxu1 %v11827_v3  ;;  %v2515_v61 = vsel %vm2047_vm3, %v12643_v2, 0  ;;  %v2596_v37 = vsub.f32 %v9520_v1, %v2518_v10 }
 0x259   :  { %v2032_v15 = vmax.f32 %v2000_v11, %v2016_v20  ;;  %v11443_v18 = vadd.f32 %v12601_v44, %v1958_v33  ;;  %v2603_v8 = vsub.f32 %v9521_v26, %v2521_v60  ;;  %v2584_v59 = vand.u32 4294901760, %v2515_v61 }
 0x25a   :  { %v12694_v38 = vsel %vm2047_vm3, %v2033_v31, 0  ;;  %v2019_v47 = vmax.f32 %v11442_v56, 0.0  ;;  %v11147_v11 = vpack.c.bf16 %v2521_v60, %v2518_v10  ;;  %v3516_v1 = vand.u32 4294901760, %v12656_v28 }
 0x25b   :  { %v12698_v54 = vsel %vm2047_vm3, %v2032_v15, 0  ;;  %v2018_v24 = vmax.f32 %v11443_v18, 0.0  ;;  %v10404_v12 = vpop.f32.mrb[28].mxu0  ;;  %v11153_v18 = vpack.c.bf16 %v2603_v8, %v2596_v37 }
 0x25c   :  { %v2035_v53 = vmax.f32 %v2003_v9, %v2019_v47  ;;  %v11444_v46 = vadd.f32 %v10404_v12, %v12601_v44  ;;  %v1970_v29 = vpop.f32.mrb[29].mxu0  ;;  %v9522_v9 = vld [vmem:[%s13156_s2 + $0x20] sm:$0xff]  ;;  %v9523_v47 = vld [vmem:[%s13156_s2 + $0x28] sm:$0xff]  ;;  %v3517_v60 = vsub.f32 %v12656_v28, %v3516_v1 }
 0x25d   :  { %v2034_v42 = vmax.f32 %v2002_v58, %v2018_v24  ;;  %v11445_v23 = vadd.f32 %v12601_v44, %v1970_v29  ;;  %v2984_v58 = vand.u32 4294901760, %v9522_v9  ;;  %v2987_v24 = vand.u32 4294901760, %v9523_v47 }
 0x25e   :  { %v12704_v55 = vsel %vm2047_vm3, %v2035_v53, 0  ;;  %v2021_v57 = vmax.f32 %v11444_v46, 0.0  ;;  %10420 = vmatmul.mubr.f32.vlgmr.msra.gmra.mrb[0].mxu1 %v12648_v40  ;;  %v3050_v46 = vand.u32 4294901760, %v12660_v6 }
 0x25f   :  { %v12709_v0 = vsel %vm2047_vm3, %v2034_v42, 0  ;;  %v2020_v63 = vmax.f32 %v11445_v23, 0.0  ;;  %v10407_v7 = vpop.f32.mrb[30].mxu0  ;;  %11136 = vmatpush3.bf16.msra.mxu1 %v11135_v16  ;;  %10426 = vmatprep.mubr.msk.f32.mxu1 %vm11828_vm2, %v11829_v35  ;;  %v3062_v12 = vsub.f32 %v9522_v9, %v2984_v58  ;;  %v3069_v53 = vsub.f32 %v9523_v47, %v2987_v24 }
 0x260   :  { %v2037_v45 = vmax.f32 %v2005_v4, %v2021_v57  ;;  %v11446_v30 = vadd.f32 %v10407_v7, %v12601_v44  ;;  %v1982_v51 = vpop.f32.mrb[31].mxu0  ;;  %11137 = vmatprep.subr.bf16.mxu1 %v11827_v3  ;;  %v3051_v23 = vsub.f32 %v12660_v6, %v3050_v46  ;;  %v11165_v4 = vpack.c.bf16 %v2987_v24, %v2984_v58 }
 0x261   :  { %v2036_v48 = vmax.f32 %v2004_v49, %v2020_v63  ;;  %v11447_v36 = vadd.f32 %v12601_v44, %v1982_v51  ;;  %v3063_v29 = vand.u32 4294901760, %v3062_v12  ;;  %v3070_v42 = vand.u32 4294901760, %v3069_v53 }
 0x262   :  { %v12721_v13 = vsel %vm2047_vm3, %v2037_v45, 0  ;;  %v2023_v27 = vmax.f32 %v11446_v30, 0.0  ;;  %v3052_v63 = vand.u32 4294901760, %v3051_v23  ;;  %v11171_v6 = vpack.c.bf16 %v3069_v53, %v3062_v12 }
 0x263   :  { %v12725_v50 = vsel %vm2047_vm3, %v2036_v48, 0  ;;  %v2022_v16 = vmax.f32 %v11447_v36, 0.0  ;;  %v3064_v57 = vsub.f32 %v3062_v12, %v3063_v29  ;;  %v3071_v49 = vsub.f32 %v3069_v53, %v3070_v42 }
 0x264   :  { %v2039_v62 = vmax.f32 %v2007_v17, %v2023_v27  ;;  %v3053_v30 = vsub.f32 %v3051_v23, %v3052_v63  ;;  %v11177_v36 = vpack.c.bf16 %v3070_v42, %v3063_v29  ;;  %v9524_v17 = vld [vmem:[%s13156_s2 + $0x30] sm:$0xff]  ;;  %v9525_v27 = vld [vmem:[%s13156_s2 + $0x38] sm:$0xff] }
 0x265   :  { %v2038_v5 = vmax.f32 %v2006_v43, %v2022_v16  ;;  %v3065_v7 = vand.u32 4294901760, %v3064_v57  ;;  %v3072_v45 = vand.u32 4294901760, %v3071_v49  ;;  %v3450_v43 = vand.u32 4294901760, %v9524_v17  ;;  %v9528_v49 = vld [vmem:[%s13156_s2 + $0x50] sm:$0xff] }
 0x266   :  { %v12728_v32 = vsel %vm2047_vm3, %v2039_v62, 0  ;;  %10427 = vmatmul.mubr.f32.vlgmr.msra.gmra.mrb[0].mxu1 %v12653_v39  ;;  %v2604_v39 = vand.u32 4294901760, %v2603_v8  ;;  %v3054_v48 = vand.u32 4294901760, %v3053_v30  ;;  %v3453_v16 = vand.u32 4294901760, %v9525_v27 }
 0x267   :  { %v12732_v44 = vsel %vm2047_vm3, %v2038_v5, 0  ;;  %11139 = vmatpush3.bf16.msra.mxu1 %v12577_v34  ;;  %10433 = vmatprep.mubr.msk.f32.mxu1 %vm11828_vm2, %v11829_v35  ;;  %v11168_v51 = vpack.c.bf16 %v3072_v45, %v3065_v7  ;;  %v3528_v62 = vsub.f32 %v9524_v17, %v3450_v43  ;;  %v4382_v7 = vand.u32 4294901760, %v9528_v49 }
 0x268   :  { %11140 = vmatprep.subr.bf16.mxu1 %v11827_v3  ;;  %v2605_v21 = vsub.f32 %v2603_v8, %v2604_v39  ;;  %v3535_v5 = vsub.f32 %v9525_v27, %v3453_v16 }
 0x269   :  { %v3529_v26 = vand.u32 4294901760, %v3528_v62  ;;  %v4460_v30 = vsub.f32 %v9528_v49, %v4382_v7 }
 0x26a   :  { %v3536_v10 = vand.u32 4294901760, %v3535_v5  ;;  %v11189_v28 = vpack.c.bf16 %v3535_v5, %v3528_v62 }
 0x26c   :  { %v3537_v8 = vsub.f32 %v3535_v5, %v3536_v10 }
 0x26e   :  { %10434 = vmatmul.mubr.f32.vlgmr.msra.gmra.mrb[0].mxu1 %v2120_v41  ;;  %v2585_v41 = vsub.f32 %v2515_v61, %v2584_v59  ;;  %v11183_v61 = vpack.c.bf16 %v3453_v16, %v3450_v43 }
 0x26f   :  { %11142 = vmatpush3.bf16.msra.mxu1 %v12596_v25  ;;  %10440 = vmatprep.mubr.msk.f32.mxu1 %vm11828_vm2, %v11829_v35  ;;  %v2597_v25 = vand.u32 4294901760, %v2596_v37 }
 0x270   :  { %11143 = vmatprep.subr.bf16.mxu1 %v11827_v3  ;;  %v2586_v31 = vand.u32 4294901760, %v2585_v41 }
 0x271   :  { %v2598_v20 = vsub.f32 %v2596_v37, %v2597_v25  ;;  %v3530_v37 = vsub.f32 %v3528_v62, %v3529_v26 }
 0x272   :  { %v2587_v56 = vsub.f32 %v2585_v41, %v2586_v31 }
 0x273   :  { %v2599_v2 = vand.u32 4294901760, %v2598_v20 }
 0x274   :  { %v2588_v15 = vand.u32 4294901760, %v2587_v56 }
 0x276   :  { %10441 = vmatmul.mubr.f32.vlgmr.msra.gmra.mrb[0].mxu1 %v12648_v40 }
 0x277   :  { %11145 = vmatpush3.bf16.msra.mxu1 %v12577_v34  ;;  %10447 = vmatprep.mubr.msk.f32.mxu1 %vm11828_vm2, %v11829_v35  ;;  %v2606_v34 = vand.u32 4294901760, %v2605_v21  ;;  %v11195_v21 = vpack.c.bf16 %v3536_v10, %v3529_v26 }
 0x278   :  { %11146 = vmatprep.subr.bf16.mxu1 %v11827_v3 }
 0x279   :  { %v11150_v33 = vpack.c.bf16 %v2606_v34, %v2599_v2  ;;  %v9527_v2 = vld [vmem:[%s13156_s2 + $0x48] sm:$0xff] }
 0x27a   :  { %v3919_v56 = vand.u32 4294901760, %v9527_v2 }
 0x27e   :  { %10448 = vmatmul.mubr.f32.vlgmr.msra.gmra.mrb[0].mxu1 %v12648_v40  ;;  %v11159_v40 = vpack.c.bf16 %v2604_v39, %v2597_v25  ;;  %v3531_v25 = vand.u32 4294901760, %v3530_v37  ;;  %v3538_v39 = vand.u32 4294901760, %v3537_v8  ;;  %v9530_v37 = vld [vmem:[%s13156_s2 + $0x60] sm:$0xff]  ;;  %v9531_v8 = vld [vmem:[%s13156_s2 + $0x68] sm:$0xff] }
 0x27f   :  { %11148 = vmatpush3.bf16.msra.mxu1 %v11147_v11  ;;  %10454 = vmatprep.mubr.msk.f32.mxu1 %vm11828_vm2, %v11829_v35 }
 0x280   :  { %11149 = vmatprep.subr.bf16.mxu1 %v11827_v3 }
 0x286   :  { %10455 = vmatmul.mubr.f32.vlgmr.msra.gmra.mrb[0].mxu1 %v2588_v15  ;;  %v4001_v15 = vsub.f32 %v9527_v2, %v3919_v56 }
 0x287   :  { %11151 = vmatpush3.bf16.msra.mxu1 %v11150_v33  ;;  %10461 = vmatprep.mubr.msk.f32.mxu1 %vm11828_vm2, %v11829_v35 }
 0x288   :  { %11152 = vmatprep.subr.bf16.mxu1 %v11827_v3  ;;  %v4002_v9 = vand.u32 4294901760, %v4001_v15 }
 0x28a   :  { %v4003_v12 = vsub.f32 %v4001_v15, %v4002_v9 }
 0x28c   :  { %v4004_v29 = vand.u32 4294901760, %v4003_v12 }
 0x28e   :  { %10462 = vmatmul.mubr.f32.vlgmr.msra.gmra.mrb[0].mxu1 %v2584_v59 }
 0x28f   :  { %11154 = vmatpush3.bf16.msra.mxu1 %v11153_v18  ;;  %10468 = vmatprep.mubr.msk.f32.mxu1 %vm11828_vm2, %v11829_v35  ;;  %v3982_v18 = vand.u32 4294901760, %v12674_v19 }
 0x290   :  { %11155 = vmatprep.subr.bf16.mxu1 %v11827_v3 }
 0x291   :  { %v3983_v47 = vsub.f32 %v12674_v19, %v3982_v18 }
 0x293   :  { %v3984_v53 = vand.u32 4294901760, %v3983_v47 }
 0x295   :  { %v3985_v42 = vsub.f32 %v3983_v47, %v3984_v53 }
 0x296   :  { %10469 = vmatmul.mubr.f32.vlgmr.msra.gmra.mrb[0].mxu1 %v2585_v41 }
 0x297   :  { %11157 = vmatpush3.bf16.msra.mxu1 %v11147_v11  ;;  %10475 = vmatprep.mubr.msk.f32.mxu1 %vm11828_vm2, %v11829_v35 }
 0x298   :  { %11158 = vmatprep.subr.bf16.mxu1 %v11827_v3 }
 0x29e   :  { %10476 = vmatmul.mubr.f32.vlgmr.msra.gmra.mrb[0].mxu1 %v2586_v31  ;;  %v9526_v31 = vld [vmem:[%s13156_s2 + $0x40] sm:$0xff] }
 0x29f   :  { %11160 = vmatpush3.bf16.msra.mxu1 %v11159_v40  ;;  %10482 = vmatprep.mubr.msk.f32.mxu1 %vm11828_vm2, %v11829_v35  ;;  %v3916_v34 = vand.u32 4294901760, %v9526_v31 }
 0x2a0   :  { %11161 = vmatprep.subr.bf16.mxu1 %v11827_v3 }
 0x2a1   :  { %v3994_v33 = vsub.f32 %v9526_v31, %v3916_v34  ;;  %v11201_v58 = vpack.c.bf16 %v3919_v56, %v3916_v34 }
 0x2a3   :  { %v3995_v40 = vand.u32 4294901760, %v3994_v33  ;;  %v11207_v19 = vpack.c.bf16 %v4001_v15, %v3994_v33 }
 0x2a5   :  { %v3996_v24 = vsub.f32 %v3994_v33, %v3995_v40  ;;  %v11213_v57 = vpack.c.bf16 %v4002_v9, %v3995_v40 }
 0x2a6   :  { %10483 = vmatmul.mubr.f32.vlgmr.msra.gmra.mrb[0].mxu1 %v2584_v59 }
 0x2a7   :  { %11163 = vmatpush3.bf16.msra.mxu1 %v11147_v11  ;;  %10489 = vmatprep.mubr.msk.f32.mxu1 %vm11828_vm2, %v11829_v35  ;;  %v11186_v11 = vpack.c.bf16 %v3538_v39, %v3531_v25  ;;  %v4851_v25 = vand.u32 4294901760, %v9531_v8 }
 0x2a8   :  { %11164 = vmatprep.subr.bf16.mxu1 %v11827_v3 }
 0x2ae   :  { %10490 = vmatmul.mubr.f32.vlgmr.msra.gmra.mrb[0].mxu1 %v2584_v59  ;;  %v3518_v59 = vand.u32 4294901760, %v3517_v60 }
 0x2af   :  { %11166 = vmatpush3.bf16.msra.mxu1 %v11165_v4  ;;  %10496 = vmatprep.mubr.msk.f32.mxu1 %vm11828_vm2, %v11829_v35 }
 0x2b0   :  { %11167 = vmatprep.subr.bf16.mxu1 %v11827_v3  ;;  %v3519_v41 = vsub.f32 %v3517_v60, %v3518_v59 }
 0x2b2   :  { %v3520_v20 = vand.u32 4294901760, %v3519_v41  ;;  %v4933_v41 = vsub.f32 %v9531_v8, %v4851_v25 }
 0x2b6   :  { %10497 = vmatmul.mubr.f32.vlgmr.msra.gmra.mrb[0].mxu1 %v3054_v48  ;;  %v4448_v48 = vand.u32 4294901760, %v12667_v14 }
 0x2b7   :  { %11169 = vmatpush3.bf16.msra.mxu1 %v11168_v51  ;;  %10503 = vmatprep.mubr.msk.f32.mxu1 %vm11828_vm2, %v11829_v35 }
 0x2b8   :  { %11170 = vmatprep.subr.bf16.mxu1 %v11827_v3  ;;  %v4449_v17 = vsub.f32 %v12667_v14, %v4448_v48 }
 0x2ba   :  { %v4450_v62 = vand.u32 4294901760, %v4449_v17 }
 0x2bc   :  { %v4451_v26 = vsub.f32 %v4449_v17, %v4450_v62 }
 0x2be   :  { %10504 = vmatmul.mubr.f32.vlgmr.msra.gmra.mrb[0].mxu1 %v3050_v46 }
 0x2bf   :  { %11172 = vmatpush3.bf16.msra.mxu1 %v11171_v6  ;;  %10510 = vmatprep.mubr.msk.f32.mxu1 %vm11828_vm2, %v11829_v35  ;;  %v4461_v6 = vand.u32 4294901760, %v4460_v30 }
 0x2c0   :  { %11173 = vmatprep.subr.bf16.mxu1 %v11827_v3 }
 0x2c1   :  { %v4462_v43 = vsub.f32 %v4460_v30, %v4461_v6 }
 0x2c3   :  { %v4463_v5 = vand.u32 4294901760, %v4462_v43 }
 0x2c6   :  { %10511 = vmatmul.mubr.f32.vlgmr.msra.gmra.mrb[0].mxu1 %v3051_v23 }
 0x2c7   :  { %11175 = vmatpush3.bf16.msra.mxu1 %v11165_v4  ;;  %10517 = vmatprep.mubr.msk.f32.mxu1 %vm11828_vm2, %v11829_v35 }
 0x2c8   :  { %11176 = vmatprep.subr.bf16.mxu1 %v11827_v3 }
 0x2ce   :  { %10518 = vmatmul.mubr.f32.vlgmr.msra.gmra.mrb[0].mxu1 %v3052_v63  ;;  %v9529_v63 = vld [vmem:[%s13156_s2 + $0x58] sm:$0xff] }
 0x2cf   :  { %11178 = vmatpush3.bf16.msra.mxu1 %v11177_v36  ;;  %10524 = vmatprep.mubr.msk.f32.mxu1 %vm11828_vm2, %v11829_v35  ;;  %v4385_v45 = vand.u32 4294901760, %v9529_v63 }
 0x2d0   :  { %11179 = vmatprep.subr.bf16.mxu1 %v11827_v3 }
 0x2d1   :  { %v4467_v51 = vsub.f32 %v9529_v63, %v4385_v45  ;;  %v11219_v27 = vpack.c.bf16 %v4385_v45, %v4382_v7 }
 0x2d3   :  { %v4468_v36 = vand.u32 4294901760, %v4467_v51  ;;  %v11225_v14 = vpack.c.bf16 %v4467_v51, %v4460_v30 }
 0x2d5   :  { %v4469_v16 = vsub.f32 %v4467_v51, %v4468_v36 }
 0x2d6   :  { %10525 = vmatmul.mubr.f32.vlgmr.msra.gmra.mrb[0].mxu1 %v3050_v46 }
 0x2d7   :  { %11181 = vmatpush3.bf16.msra.mxu1 %v11165_v4  ;;  %10531 = vmatprep.mubr.msk.f32.mxu1 %vm11828_vm2, %v11829_v35  ;;  %v3986_v4 = vand.u32 4294901760, %v3985_v42  ;;  %v5380_v42 = vand.u32 4294901760, %v12680_v52 }
 0x2d8   :  { %11182 = vmatprep.subr.bf16.mxu1 %v11827_v3 }
 0x2de   :  { %10532 = vmatmul.mubr.f32.vlgmr.msra.gmra.mrb[0].mxu1 %v3050_v46  ;;  %v3997_v46 = vand.u32 4294901760, %v3996_v24  ;;  %v9533_v24 = vld [vmem:[%s13156_s2 + $0x78] sm:$0xff] }
 0x2df   :  { %11184 = vmatpush3.bf16.msra.mxu1 %v11183_v61  ;;  %10538 = vmatprep.mubr.msk.f32.mxu1 %vm11828_vm2, %v11829_v35 }
 0x2e0   :  { %11185 = vmatprep.subr.bf16.mxu1 %v11827_v3  ;;  %v11204_v23 = vpack.c.bf16 %v4004_v29, %v3997_v46 }
 0x2e6   :  { %10539 = vmatmul.mubr.f32.vlgmr.msra.gmra.mrb[0].mxu1 %v3520_v20 }
 0x2e7   :  { %11187 = vmatpush3.bf16.msra.mxu1 %v11186_v11  ;;  %10545 = vmatprep.mubr.msk.f32.mxu1 %vm11828_vm2, %v11829_v35  ;;  %v4914_v11 = vand.u32 4294901760, %v12684_v22 }
 0x2e8   :  { %11188 = vmatprep.subr.bf16.mxu1 %v11827_v3 }
 0x2ee   :  { %10546 = vmatmul.mubr.f32.vlgmr.msra.gmra.mrb[0].mxu1 %v3516_v1 }
 0x2ef   :  { %11190 = vmatpush3.bf16.msra.mxu1 %v11189_v28  ;;  %10552 = vmatprep.mubr.msk.f32.mxu1 %vm11828_vm2, %v11829_v35  ;;  %v4934_v28 = vand.u32 4294901760, %v4933_v41 }
 0x2f0   :  { %11191 = vmatprep.subr.bf16.mxu1 %v11827_v3 }
 0x2f1   :  { %v4935_v34 = vsub.f32 %v4933_v41, %v4934_v28 }
 0x2f3   :  { %v4936_v15 = vand.u32 4294901760, %v4935_v34 }
 0x2f6   :  { %10553 = vmatmul.mubr.f32.vlgmr.msra.gmra.mrb[0].mxu1 %v3517_v60  ;;  %v4452_v60 = vand.u32 4294901760, %v4451_v26 }
 0x2f7   :  { %11193 = vmatpush3.bf16.msra.mxu1 %v11183_v61  ;;  %10559 = vmatprep.mubr.msk.f32.mxu1 %vm11828_vm2, %v11829_v35 }
 0x2f8   :  { %11194 = vmatprep.subr.bf16.mxu1 %v11827_v3 }
 0x2fe   :  { %10560 = vmatmul.mubr.f32.vlgmr.msra.gmra.mrb[0].mxu1 %v3518_v59  ;;  %v4848_v59 = vand.u32 4294901760, %v9530_v37 }
 0x2ff   :  { %11196 = vmatpush3.bf16.msra.mxu1 %v11195_v21  ;;  %10566 = vmatprep.mubr.msk.f32.mxu1 %vm11828_vm2, %v11829_v35  ;;  %v4915_v21 = vsub.f32 %v12684_v22, %v4914_v11 }
 0x300   :  { %11197 = vmatprep.subr.bf16.mxu1 %v11827_v3  ;;  %v4926_v39 = vsub.f32 %v9530_v37, %v4848_v59  ;;  %v11237_v31 = vpack.c.bf16 %v4851_v25, %v4848_v59 }
 0x301   :  { %v4916_v56 = vand.u32 4294901760, %v4915_v21 }
 0x302   :  { %v4927_v20 = vand.u32 4294901760, %v4926_v39  ;;  %v11243_v22 = vpack.c.bf16 %v4933_v41, %v4926_v39 }
 0x304   :  { %v4928_v2 = vsub.f32 %v4926_v39, %v4927_v20 }
 0x306   :  { %10567 = vmatmul.mubr.f32.vlgmr.msra.gmra.mrb[0].mxu1 %v3516_v1  ;;  %v4929_v33 = vand.u32 4294901760, %v4928_v2 }
 0x307   :  { %11199 = vmatpush3.bf16.msra.mxu1 %v11183_v61  ;;  %10573 = vmatprep.mubr.msk.f32.mxu1 %vm11828_vm2, %v11829_v35  ;;  %v11231_v61 = vpack.c.bf16 %v4468_v36, %v4461_v6 }
 0x308   :  { %11200 = vmatprep.subr.bf16.mxu1 %v11827_v3  ;;  %v11240_v40 = vpack.c.bf16 %v4936_v15, %v4929_v33  ;;  %v6312_v33 = vand.u32 4294901760, %v12694_v38 }
 0x30e   :  { %10574 = vmatmul.mubr.f32.vlgmr.msra.gmra.mrb[0].mxu1 %v3516_v1  ;;  %v4470_v1 = vand.u32 4294901760, %v4469_v16 }
 0x30f   :  { %11202 = vmatpush3.bf16.msra.mxu1 %v11201_v58  ;;  %10580 = vmatprep.mubr.msk.f32.mxu1 %vm11828_vm2, %v11829_v35 }
 0x310   :  { %11203 = vmatprep.subr.bf16.mxu1 %v11827_v3  ;;  %v11222_v10 = vpack.c.bf16 %v4470_v1, %v4463_v5  ;;  %v5846_v1 = vand.u32 4294901760, %v12698_v54 }
 0x316   :  { %10581 = vmatmul.mubr.f32.vlgmr.msra.gmra.mrb[0].mxu1 %v3986_v4 }
 0x317   :  { %11205 = vmatpush3.bf16.msra.mxu1 %v11204_v23  ;;  %10587 = vmatprep.mubr.msk.f32.mxu1 %vm11828_vm2, %v11829_v35 }
 0x318   :  { %11206 = vmatprep.subr.bf16.mxu1 %v11827_v3 }
 0x31e   :  { %10588 = vmatmul.mubr.f32.vlgmr.msra.gmra.mrb[0].mxu1 %v3982_v18 }
 0x31f   :  { %11208 = vmatpush3.bf16.msra.mxu1 %v11207_v19  ;;  %10594 = vmatprep.mubr.msk.f32.mxu1 %vm11828_vm2, %v11829_v35  ;;  %v5381_v19 = vsub.f32 %v12680_v52, %v5380_v42 }
 0x320   :  { %11209 = vmatprep.subr.bf16.mxu1 %v11827_v3 }
 0x321   :  { %v5382_v7 = vand.u32 4294901760, %v5381_v19 }
 0x323   :  { %v5383_v51 = vsub.f32 %v5381_v19, %v5382_v7 }
 0x325   :  { %v5384_v6 = vand.u32 4294901760, %v5383_v51 }
 0x326   :  { %10595 = vmatmul.mubr.f32.vlgmr.msra.gmra.mrb[0].mxu1 %v3983_v47  ;;  %v11249_v47 = vpack.c.bf16 %v4934_v28, %v4927_v20  ;;  %v9536_v28 = vld [vmem:[%s13156_s2 + $0x90] sm:$0xff] }
 0x327   :  { %11211 = vmatpush3.bf16.msra.mxu1 %v11201_v58  ;;  %10601 = vmatprep.mubr.msk.f32.mxu1 %vm11828_vm2, %v11829_v35 }
 0x328   :  { %11212 = vmatprep.subr.bf16.mxu1 %v11827_v3 }
 0x32e   :  { %10602 = vmatmul.mubr.f32.vlgmr.msra.gmra.mrb[0].mxu1 %v3984_v53  ;;  %v5317_v53 = vand.u32 4294901760, %v9533_v24 }
 0x32f   :  { %11214 = vmatpush3.bf16.msra.mxu1 %v11213_v57  ;;  %10608 = vmatprep.mubr.msk.f32.mxu1 %vm11828_vm2, %v11829_v35 }
 0x330   :  { %11215 = vmatprep.subr.bf16.mxu1 %v11827_v3  ;;  %v5399_v29 = vsub.f32 %v9533_v24, %v5317_v53 }
 0x332   :  { %v5400_v4 = vand.u32 4294901760, %v5399_v29 }
 0x334   :  { %v5401_v63 = vsub.f32 %v5399_v29, %v5400_v4 }
 0x336   :  { %10609 = vmatmul.mubr.f32.vlgmr.msra.gmra.mrb[0].mxu1 %v3982_v18  ;;  %v5402_v30 = vand.u32 4294901760, %v5401_v63 }
 0x337   :  { %11217 = vmatpush3.bf16.msra.mxu1 %v11201_v58  ;;  %10615 = vmatprep.mubr.msk.f32.mxu1 %vm11828_vm2, %v11829_v35  ;;  %v9532_v58 = vld [vmem:[%s13156_s2 + $0x70] sm:$0xff] }
 0x338   :  { %11218 = vmatprep.subr.bf16.mxu1 %v11827_v3  ;;  %v5314_v12 = vand.u32 4294901760, %v9532_v58 }
 0x33a   :  { %v5392_v46 = vsub.f32 %v9532_v58, %v5314_v12  ;;  %v11255_v57 = vpack.c.bf16 %v5317_v53, %v5314_v12 }
 0x33c   :  { %v5393_v23 = vand.u32 4294901760, %v5392_v46  ;;  %v11261_v52 = vpack.c.bf16 %v5399_v29, %v5392_v46 }
 0x33e   :  { %10616 = vmatmul.mubr.f32.vlgmr.msra.gmra.mrb[0].mxu1 %v3982_v18  ;;  %v4917_v18 = vsub.f32 %v4915_v21, %v4916_v56  ;;  %v5394_v49 = vsub.f32 %v5392_v46, %v5393_v23  ;;  %v11267_v36 = vpack.c.bf16 %v5400_v4, %v5393_v23  ;;  %v9538_v23 = vld [vmem:[%s13156_s2 + $0xa0] sm:$0xff]  ;;  %v9539_v4 = vld [vmem:[%s13156_s2 + $0xa8] sm:$0xff] }
 0x33f   :  { %11220 = vmatpush3.bf16.msra.mxu1 %v11219_v27  ;;  %10622 = vmatprep.mubr.msk.f32.mxu1 %vm11828_vm2, %v11829_v35 }
 0x340   :  { %11221 = vmatprep.subr.bf16.mxu1 %v11827_v3  ;;  %v4918_v9 = vand.u32 4294901760, %v4917_v18  ;;  %v5395_v45 = vand.u32 4294901760, %v5394_v49 }
 0x346   :  { %10623 = vmatmul.mubr.f32.vlgmr.msra.gmra.mrb[0].mxu1 %v4452_v60  ;;  %v5847_v60 = vsub.f32 %v12698_v54, %v5846_v1 }
 0x347   :  { %11223 = vmatpush3.bf16.msra.mxu1 %v11222_v10  ;;  %10629 = vmatprep.mubr.msk.f32.mxu1 %vm11828_vm2, %v11829_v35 }
 0x348   :  { %11224 = vmatprep.subr.bf16.mxu1 %v11827_v3  ;;  %v5848_v8 = vand.u32 4294901760, %v5847_v60 }
 0x34a   :  { %v5849_v39 = vsub.f32 %v5847_v60, %v5848_v8 }
 0x34e   :  { %10630 = vmatmul.mubr.f32.vlgmr.msra.gmra.mrb[0].mxu1 %v4448_v48 }
 0x34f   :  { %11226 = vmatpush3.bf16.msra.mxu1 %v11225_v14  ;;  %10636 = vmatprep.mubr.msk.f32.mxu1 %vm11828_vm2, %v11829_v35 }
 0x350   :  { %11227 = vmatprep.subr.bf16.mxu1 %v11827_v3 }
 0x356   :  { %10637 = vmatmul.mubr.f32.vlgmr.msra.gmra.mrb[0].mxu1 %v4449_v17  ;;  %v9534_v17 = vld [vmem:[%s13156_s2 + $0x80] sm:$0xff] }
 0x357   :  { %11229 = vmatpush3.bf16.msra.mxu1 %v11219_v27  ;;  %10643 = vmatprep.mubr.msk.f32.mxu1 %vm11828_vm2, %v11829_v35  ;;  %v5780_v43 = vand.u32 4294901760, %v9534_v17 }
 0x358   :  { %11230 = vmatprep.subr.bf16.mxu1 %v11827_v3 }
 0x35e   :  { %10644 = vmatmul.mubr.f32.vlgmr.msra.gmra.mrb[0].mxu1 %v4450_v62  ;;  %v5858_v62 = vsub.f32 %v9534_v17, %v5780_v43 }
 0x35f   :  { %11232 = vmatpush3.bf16.msra.mxu1 %v11231_v61  ;;  %10650 = vmatprep.mubr.msk.f32.mxu1 %vm11828_vm2, %v11829_v35 }
 0x360   :  { %11233 = vmatprep.subr.bf16.mxu1 %v11827_v3  ;;  %v5859_v26 = vand.u32 4294901760, %v5858_v62 }
 0x362   :  { %v5860_v61 = vsub.f32 %v5858_v62, %v5859_v26 }
 0x364   :  { %v5861_v59 = vand.u32 4294901760, %v5860_v61 }
 0x366   :  { %10651 = vmatmul.mubr.f32.vlgmr.msra.gmra.mrb[0].mxu1 %v4448_v48 }
 0x367   :  { %11235 = vmatpush3.bf16.msra.mxu1 %v11219_v27  ;;  %10657 = vmatprep.mubr.msk.f32.mxu1 %vm11828_vm2, %v11829_v35  ;;  %v9535_v27 = vld [vmem:[%s13156_s2 + $0x88] sm:$0xff] }
 0x368   :  { %11236 = vmatprep.subr.bf16.mxu1 %v11827_v3  ;;  %v5783_v16 = vand.u32 4294901760, %v9535_v27 }
 0x36a   :  { %v5865_v5 = vsub.f32 %v9535_v27, %v5783_v16  ;;  %v11273_v14 = vpack.c.bf16 %v5783_v16, %v5780_v43 }
 0x36c   :  { %v5866_v10 = vand.u32 4294901760, %v5865_v5  ;;  %v11279_v54 = vpack.c.bf16 %v5865_v5, %v5858_v62 }
 0x36e   :  { %10658 = vmatmul.mubr.f32.vlgmr.msra.gmra.mrb[0].mxu1 %v4448_v48  ;;  %v11258_v48 = vpack.c.bf16 %v5402_v30, %v5395_v45  ;;  %v5867_v37 = vsub.f32 %v5865_v5, %v5866_v10  ;;  %v11285_v20 = vpack.c.bf16 %v5866_v10, %v5859_v26  ;;  %v9541_v26 = vld [vmem:[%s13156_s2 + $0xb8] sm:$0xff] }
 0x36f   :  { %11238 = vmatpush3.bf16.msra.mxu1 %v11237_v31  ;;  %10664 = vmatprep.mubr.msk.f32.mxu1 %vm11828_vm2, %v11829_v35 }
 0x370   :  { %11239 = vmatprep.subr.bf16.mxu1 %v11827_v3  ;;  %v5868_v25 = vand.u32 4294901760, %v5867_v37  ;;  %v7244_v37 = vand.u32 4294901760, %v12704_v55 }
 0x372   :  { %v11276_v41 = vpack.c.bf16 %v5868_v25, %v5861_v59  ;;  %v7245_v25 = vsub.f32 %v12704_v55, %v7244_v37 }
 0x376   :  { %10665 = vmatmul.mubr.f32.vlgmr.msra.gmra.mrb[0].mxu1 %v4918_v9 }
 0x377   :  { %11241 = vmatpush3.bf16.msra.mxu1 %v11240_v40  ;;  %10671 = vmatprep.mubr.msk.f32.mxu1 %vm11828_vm2, %v11829_v35  ;;  %v6313_v40 = vsub.f32 %v12694_v38, %v6312_v33 }
 0x378   :  { %11242 = vmatprep.subr.bf16.mxu1 %v11827_v3 }
 0x379   :  { %v6314_v58 = vand.u32 4294901760, %v6313_v40 }
 0x37b   :  { %v6315_v53 = vsub.f32 %v6313_v40, %v6314_v58 }
 0x37d   :  { %v6316_v29 = vand.u32 4294901760, %v6315_v53 }
 0x37e   :  { %10672 = vmatmul.mubr.f32.vlgmr.msra.gmra.mrb[0].mxu1 %v4914_v11 }
 0x37f   :  { %11244 = vmatpush3.bf16.msra.mxu1 %v11243_v22  ;;  %10678 = vmatprep.mubr.msk.f32.mxu1 %vm11828_vm2, %v11829_v35 }
 0x380   :  { %11245 = vmatprep.subr.bf16.mxu1 %v11827_v3 }
 0x386   :  { %10679 = vmatmul.mubr.f32.vlgmr.msra.gmra.mrb[0].mxu1 %v4915_v21  ;;  %v9537_v21 = vld [vmem:[%s13156_s2 + $0x98] sm:$0xff] }
 0x387   :  { %11247 = vmatpush3.bf16.msra.mxu1 %v11237_v31  ;;  %10685 = vmatprep.mubr.msk.f32.mxu1 %vm11828_vm2, %v11829_v35  ;;  %v6249_v2 = vand.u32 4294901760, %v9537_v21 }
 0x388   :  { %11248 = vmatprep.subr.bf16.mxu1 %v11827_v3 }
 0x38e   :  { %10686 = vmatmul.mubr.f32.vlgmr.msra.gmra.mrb[0].mxu1 %v4916_v56  ;;  %v6331_v56 = vsub.f32 %v9537_v21, %v6249_v2 }
 0x38f   :  { %11250 = vmatpush3.bf16.msra.mxu1 %v11249_v47  ;;  %10692 = vmatprep.mubr.msk.f32.mxu1 %vm11828_vm2, %v11829_v35 }
 0x390   :  { %11251 = vmatprep.subr.bf16.mxu1 %v11827_v3  ;;  %v6332_v18 = vand.u32 4294901760, %v6331_v56 }
 0x392   :  { %v6333_v47 = vsub.f32 %v6331_v56, %v6332_v18 }
 0x394   :  { %v6334_v12 = vand.u32 4294901760, %v6333_v47 }
 0x396   :  { %10693 = vmatmul.mubr.f32.vlgmr.msra.gmra.mrb[0].mxu1 %v4914_v11 }
 0x397   :  { %11253 = vmatpush3.bf16.msra.mxu1 %v11237_v31  ;;  %10699 = vmatprep.mubr.msk.f32.mxu1 %vm11828_vm2, %v11829_v35  ;;  %v6246_v31 = vand.u32 4294901760, %v9536_v28 }
 0x398   :  { %11254 = vmatprep.subr.bf16.mxu1 %v11827_v3 }
 0x399   :  { %v6324_v34 = vsub.f32 %v9536_v28, %v6246_v31  ;;  %v11291_v9 = vpack.c.bf16 %v6249_v2, %v6246_v31 }
 0x39b   :  { %v6325_v15 = vand.u32 4294901760, %v6324_v34  ;;  %v11297_v38 = vpack.c.bf16 %v6331_v56, %v6324_v34  ;;  %v9542_v56 = vld [vmem:[%s13156_s2 + $0xc0] sm:$0xff] }
 0x39d   :  { %v6326_v22 = vsub.f32 %v6324_v34, %v6325_v15 }
 0x39e   :  { %10700 = vmatmul.mubr.f32.vlgmr.msra.gmra.mrb[0].mxu1 %v4914_v11  ;;  %v5850_v11 = vand.u32 4294901760, %v5849_v39 }
 0x39f   :  { %11256 = vmatpush3.bf16.msra.mxu1 %v11255_v57  ;;  %10706 = vmatprep.mubr.msk.f32.mxu1 %vm11828_vm2, %v11829_v35  ;;  %v6327_v24 = vand.u32 4294901760, %v6326_v22  ;;  %v7710_v22 = vand.u32 4294901760, %v12725_v50 }
 0x3a0   :  { %11257 = vmatprep.subr.bf16.mxu1 %v11827_v3 }
 0x3a1   :  { %v11294_v46 = vpack.c.bf16 %v6334_v12, %v6327_v24  ;;  %v7711_v24 = vsub.f32 %v12725_v50, %v7710_v22 }
 0x3a6   :  { %10707 = vmatmul.mubr.f32.vlgmr.msra.gmra.mrb[0].mxu1 %v5384_v6 }
 0x3a7   :  { %11259 = vmatpush3.bf16.msra.mxu1 %v11258_v48  ;;  %10713 = vmatprep.mubr.msk.f32.mxu1 %vm11828_vm2, %v11829_v35 }
 0x3a8   :  { %11260 = vmatprep.subr.bf16.mxu1 %v11827_v3 }
 0x3ae   :  { %10714 = vmatmul.mubr.f32.vlgmr.msra.gmra.mrb[0].mxu1 %v5380_v42 }
 0x3af   :  { %11262 = vmatpush3.bf16.msra.mxu1 %v11261_v52  ;;  %10720 = vmatprep.mubr.msk.f32.mxu1 %vm11828_vm2, %v11829_v35 }
 0x3b0   :  { %11263 = vmatprep.subr.bf16.mxu1 %v11827_v3 }
 0x3b6   :  { %10721 = vmatmul.mubr.f32.vlgmr.msra.gmra.mrb[0].mxu1 %v5381_v19  ;;  %v6712_v19 = vand.u32 4294901760, %v9538_v23 }
 0x3b7   :  { %11265 = vmatpush3.bf16.msra.mxu1 %v11255_v57  ;;  %10727 = vmatprep.mubr.msk.f32.mxu1 %vm11828_vm2, %v11829_v35 }
 0x3b8   :  { %11266 = vmatprep.subr.bf16.mxu1 %v11827_v3  ;;  %v6790_v49 = vsub.f32 %v9538_v23, %v6712_v19 }
 0x3ba   :  { %v6791_v45 = vand.u32 4294901760, %v6790_v49 }
 0x3bc   :  { %v6792_v6 = vsub.f32 %v6790_v49, %v6791_v45 }
 0x3be   :  { %10728 = vmatmul.mubr.f32.vlgmr.msra.gmra.mrb[0].mxu1 %v5382_v7  ;;  %v6778_v7 = vand.u32 4294901760, %v12709_v0  ;;  %v6793_v17 = vand.u32 4294901760, %v6792_v6 }
 0x3bf   :  { %11268 = vmatpush3.bf16.msra.mxu1 %v11267_v36  ;;  %10734 = vmatprep.mubr.msk.f32.mxu1 %vm11828_vm2, %v11829_v35 }
 0x3c0   :  { %11269 = vmatprep.subr.bf16.mxu1 %v11827_v3  ;;  %v6779_v51 = vsub.f32 %v12709_v0, %v6778_v7 }
 0x3c2   :  { %v6780_v36 = vand.u32 4294901760, %v6779_v51 }
 0x3c4   :  { %v6781_v43 = vsub.f32 %v6779_v51, %v6780_v36 }
 0x3c6   :  { %10735 = vmatmul.mubr.f32.vlgmr.msra.gmra.mrb[0].mxu1 %v5380_v42  ;;  %v6782_v62 = vand.u32 4294901760, %v6781_v43 }
 0x3c7   :  { %11271 = vmatpush3.bf16.msra.mxu1 %v11255_v57  ;;  %10741 = vmatprep.mubr.msk.f32.mxu1 %vm11828_vm2, %v11829_v35  ;;  %v6715_v57 = vand.u32 4294901760, %v9539_v4 }
 0x3c8   :  { %11272 = vmatprep.subr.bf16.mxu1 %v11827_v3 }
 0x3c9   :  { %v6797_v63 = vsub.f32 %v9539_v4, %v6715_v57  ;;  %v11309_v48 = vpack.c.bf16 %v6715_v57, %v6712_v19 }
 0x3cb   :  { %v6798_v30 = vand.u32 4294901760, %v6797_v63  ;;  %v11315_v0 = vpack.c.bf16 %v6797_v63, %v6790_v49  ;;  %v9544_v49 = vld [vmem:[%s13156_s2 + $0xd0] sm:$0xff] }
 0x3cd   :  { %v6799_v52 = vsub.f32 %v6797_v63, %v6798_v30  ;;  %v11321_v5 = vpack.c.bf16 %v6798_v30, %v6791_v45  ;;  %v9545_v63 = vld [vmem:[%s13156_s2 + $0xd8] sm:$0xff] }
 0x3ce   :  { %10742 = vmatmul.mubr.f32.vlgmr.msra.gmra.mrb[0].mxu1 %v5380_v42  ;;  %v11303_v42 = vpack.c.bf16 %v6332_v18, %v6325_v15  ;;  %v7644_v15 = vand.u32 4294901760, %v9542_v56  ;;  %v8113_v45 = vand.u32 4294901760, %v9545_v63 }
 0x3cf   :  { %11274 = vmatpush3.bf16.msra.mxu1 %v11273_v14  ;;  %10748 = vmatprep.mubr.msk.f32.mxu1 %vm11828_vm2, %v11829_v35  ;;  %v6800_v27 = vand.u32 4294901760, %v6799_v52 }
 0x3d0   :  { %11275 = vmatprep.subr.bf16.mxu1 %v11827_v3 }
 0x3d1   :  { %v11312_v16 = vpack.c.bf16 %v6800_v27, %v6793_v17 }
 0x3d6   :  { %10749 = vmatmul.mubr.f32.vlgmr.msra.gmra.mrb[0].mxu1 %v5850_v11 }
 0x3d7   :  { %11277 = vmatpush3.bf16.msra.mxu1 %v11276_v41  ;;  %10755 = vmatprep.mubr.msk.f32.mxu1 %vm11828_vm2, %v11829_v35 }
 0x3d8   :  { %11278 = vmatprep.subr.bf16.mxu1 %v11827_v3 }
 0x3de   :  { %10756 = vmatmul.mubr.f32.vlgmr.msra.gmra.mrb[0].mxu1 %v5846_v1 }
 0x3df   :  { %11280 = vmatpush3.bf16.msra.mxu1 %v11279_v54  ;;  %10762 = vmatprep.mubr.msk.f32.mxu1 %vm11828_vm2, %v11829_v35  ;;  %v7246_v54 = vand.u32 4294901760, %v7245_v25 }
 0x3e0   :  { %11281 = vmatprep.subr.bf16.mxu1 %v11827_v3 }
 0x3e1   :  { %v7247_v21 = vsub.f32 %v7245_v25, %v7246_v54 }
 0x3e3   :  { %v7248_v2 = vand.u32 4294901760, %v7247_v21 }
 0x3e6   :  { %10763 = vmatmul.mubr.f32.vlgmr.msra.gmra.mrb[0].mxu1 %v5847_v60  ;;  %v7181_v60 = vand.u32 4294901760, %v9541_v26 }
 0x3e7   :  { %11283 = vmatpush3.bf16.msra.mxu1 %v11273_v14  ;;  %10769 = vmatprep.mubr.msk.f32.mxu1 %vm11828_vm2, %v11829_v35 }
 0x3e8   :  { %11284 = vmatprep.subr.bf16.mxu1 %v11827_v3  ;;  %v7263_v61 = vsub.f32 %v9541_v26, %v7181_v60 }
 0x3ea   :  { %v7264_v59 = vand.u32 4294901760, %v7263_v61 }
 0x3ec   :  { %v7265_v11 = vsub.f32 %v7263_v61, %v7264_v59 }
 0x3ee   :  { %10770 = vmatmul.mubr.f32.vlgmr.msra.gmra.mrb[0].mxu1 %v5848_v8  ;;  %v7266_v28 = vand.u32 4294901760, %v7265_v11 }
 0x3ef   :  { %11286 = vmatpush3.bf16.msra.mxu1 %v11285_v20  ;;  %10776 = vmatprep.mubr.msk.f32.mxu1 %vm11828_vm2, %v11829_v35 }
 0x3f0   :  { %11287 = vmatprep.subr.bf16.mxu1 %v11827_v3 }
 0x3f6   :  { %10777 = vmatmul.mubr.f32.vlgmr.msra.gmra.mrb[0].mxu1 %v5846_v1 }
 0x3f7   :  { %11289 = vmatpush3.bf16.msra.mxu1 %v11273_v14  ;;  %10783 = vmatprep.mubr.msk.f32.mxu1 %vm11828_vm2, %v11829_v35 }
 0x3f8   :  { %11290 = vmatprep.subr.bf16.mxu1 %v11827_v3 }
 0x3fe   :  { %10784 = vmatmul.mubr.f32.vlgmr.msra.gmra.mrb[0].mxu1 %v5846_v1  ;;  %v9540_v1 = vld [vmem:[%s13156_s2 + $0xb0] sm:$0xff] }
 0x3ff   :  { %11292 = vmatpush3.bf16.msra.mxu1 %v11291_v9  ;;  %10790 = vmatprep.mubr.msk.f32.mxu1 %vm11828_vm2, %v11829_v35  ;;  %v7178_v10 = vand.u32 4294901760, %v9540_v1 }
 0x400   :  { %11293 = vmatprep.subr.bf16.mxu1 %v11827_v3 }
 0x401   :  { %v7256_v14 = vsub.f32 %v9540_v1, %v7178_v10  ;;  %v11327_v39 = vpack.c.bf16 %v7181_v60, %v7178_v10  ;;  %v9546_v60 = vld [vmem:[%s13156_s2 + $0xe0] sm:$0xff] }
 0x403   :  { %v7257_v8 = vand.u32 4294901760, %v7256_v14  ;;  %v11333_v55 = vpack.c.bf16 %v7263_v61, %v7256_v14  ;;  %v8576_v61 = vand.u32 4294901760, %v9546_v60 }
 0x405   :  { %v7258_v41 = vsub.f32 %v7256_v14, %v7257_v8  ;;  %v11339_v34 = vpack.c.bf16 %v7264_v59, %v7257_v8  ;;  %v9547_v14 = vld [vmem:[%s13156_s2 + $0xe8] sm:$0xff]  ;;  %v8654_v8 = vsub.f32 %v9546_v60, %v8576_v61 }
 0x406   :  { %10791 = vmatmul.mubr.f32.vlgmr.msra.gmra.mrb[0].mxu1 %v6316_v29  ;;  %v7712_v29 = vand.u32 4294901760, %v7711_v24 }
 0x407   :  { %11295 = vmatpush3.bf16.msra.mxu1 %v11294_v46  ;;  %10797 = vmatprep.mubr.msk.f32.mxu1 %vm11828_vm2, %v11829_v35  ;;  %v7259_v20 = vand.u32 4294901760, %v7258_v41 }
 0x408   :  { %11296 = vmatprep.subr.bf16.mxu1 %v11827_v3  ;;  %v7713_v23 = vsub.f32 %v7711_v24, %v7712_v29 }
 0x409   :  { %v11330_v31 = vpack.c.bf16 %v7266_v28, %v7259_v20 }
 0x40a   :  { %v7714_v19 = vand.u32 4294901760, %v7713_v23 }
 0x40e   :  { %10798 = vmatmul.mubr.f32.vlgmr.msra.gmra.mrb[0].mxu1 %v6312_v33 }
 0x40f   :  { %11298 = vmatpush3.bf16.msra.mxu1 %v11297_v38  ;;  %10804 = vmatprep.mubr.msk.f32.mxu1 %vm11828_vm2, %v11829_v35 }
 0x410   :  { %11299 = vmatprep.subr.bf16.mxu1 %v11827_v3 }
 0x416   :  { %10805 = vmatmul.mubr.f32.vlgmr.msra.gmra.mrb[0].mxu1 %v6313_v40  ;;  %v7722_v40 = vsub.f32 %v9542_v56, %v7644_v15 }
 0x417   :  { %11301 = vmatpush3.bf16.msra.mxu1 %v11291_v9  ;;  %10811 = vmatprep.mubr.msk.f32.mxu1 %vm11828_vm2, %v11829_v35 }
 0x418   :  { %11302 = vmatprep.subr.bf16.mxu1 %v11827_v3  ;;  %v7723_v47 = vand.u32 4294901760, %v7722_v40 }
 0x41a   :  { %v7724_v53 = vsub.f32 %v7722_v40, %v7723_v47 }
 0x41c   :  { %v7725_v38 = vand.u32 4294901760, %v7724_v53 }
 0x41e   :  { %10812 = vmatmul.mubr.f32.vlgmr.msra.gmra.mrb[0].mxu1 %v6314_v58 }
 0x41f   :  { %11304 = vmatpush3.bf16.msra.mxu1 %v11303_v42  ;;  %10818 = vmatprep.mubr.msk.f32.mxu1 %vm11828_vm2, %v11829_v35 }
 0x420   :  { %11305 = vmatprep.subr.bf16.mxu1 %v11827_v3 }
 0x426   :  { %10819 = vmatmul.mubr.f32.vlgmr.msra.gmra.mrb[0].mxu1 %v6312_v33 }
 0x427   :  { %11307 = vmatpush3.bf16.msra.mxu1 %v11291_v9  ;;  %10825 = vmatprep.mubr.msk.f32.mxu1 %vm11828_vm2, %v11829_v35 }
 0x428   :  { %11308 = vmatprep.subr.bf16.mxu1 %v11827_v3 }
 0x42e   :  { %10826 = vmatmul.mubr.f32.vlgmr.msra.gmra.mrb[0].mxu1 %v6312_v33  ;;  %v9543_v33 = vld [vmem:[%s13156_s2 + $0xc8] sm:$0xff] }
 0x42f   :  { %11310 = vmatpush3.bf16.msra.mxu1 %v11309_v48  ;;  %10832 = vmatprep.mubr.msk.f32.mxu1 %vm11828_vm2, %v11829_v35  ;;  %v7647_v18 = vand.u32 4294901760, %v9543_v33 }
 0x430   :  { %11311 = vmatprep.subr.bf16.mxu1 %v11827_v3 }
 0x431   :  { %v7729_v9 = vsub.f32 %v9543_v33, %v7647_v18  ;;  %v11345_v12 = vpack.c.bf16 %v7647_v18, %v7644_v15  ;;  %v9548_v15 = vld [vmem:[%s13156_s2 + $0xf0] sm:$0xff]  ;;  %v9549_v18 = vld [vmem:[%s13156_s2 + $0xf8] sm:$0xff] }
 0x433   :  { %v7730_v58 = vand.u32 4294901760, %v7729_v9  ;;  %v11351_v50 = vpack.c.bf16 %v7729_v9, %v7722_v40  ;;  %v9042_v40 = vand.u32 4294901760, %v9548_v15 }
 0x435   :  { %v7731_v46 = vsub.f32 %v7729_v9, %v7730_v58  ;;  %v11357_v57 = vpack.c.bf16 %v7730_v58, %v7723_v47  ;;  %v9045_v9 = vand.u32 4294901760, %v9549_v18  ;;  %v9108_v58 = vand.u32 4294901760, %v12728_v32 }
 0x436   :  { %10833 = vmatmul.mubr.f32.vlgmr.msra.gmra.mrb[0].mxu1 %v6782_v62 }
 0x437   :  { %11313 = vmatpush3.bf16.msra.mxu1 %v11312_v16  ;;  %10839 = vmatprep.mubr.msk.f32.mxu1 %vm11828_vm2, %v11829_v35  ;;  %v7732_v42 = vand.u32 4294901760, %v7731_v46  ;;  %v9127_v47 = vsub.f32 %v9549_v18, %v9045_v9  ;;  %v9109_v53 = vsub.f32 %v12728_v32, %v9108_v58  ;;  %v11399_v46 = vpack.c.bf16 %v9045_v9, %v9042_v40 }
 0x438   :  { %11314 = vmatprep.subr.bf16.mxu1 %v11827_v3 }
 0x439   :  { %v11348_v4 = vpack.c.bf16 %v7732_v42, %v7725_v38  ;;  %v9110_v42 = vand.u32 4294901760, %v9109_v53 }
 0x43e   :  { %10840 = vmatmul.mubr.f32.vlgmr.msra.gmra.mrb[0].mxu1 %v6778_v7 }
 0x43f   :  { %11316 = vmatpush3.bf16.msra.mxu1 %v11315_v0  ;;  %10846 = vmatprep.mubr.msk.f32.mxu1 %vm11828_vm2, %v11829_v35 }
 0x440   :  { %11317 = vmatprep.subr.bf16.mxu1 %v11827_v3 }
 0x446   :  { %10847 = vmatmul.mubr.f32.vlgmr.msra.gmra.mrb[0].mxu1 %v6779_v51  ;;  %v8195_v51 = vsub.f32 %v9545_v63, %v8113_v45  ;;  %v9519_v63 = vld [vmem:[%s13157_s3 + $0x1] ss:$0 sm:$0xff] }
 0x447   :  { %11319 = vmatpush3.bf16.msra.mxu1 %v11309_v48  ;;  %10853 = vmatprep.mubr.msk.f32.mxu1 %vm11828_vm2, %v11829_v35 }
 0x448   :  { %11320 = vmatprep.subr.bf16.mxu1 %v11827_v3  ;;  %v8196_v52 = vand.u32 4294901760, %v8195_v51 }
 0x44a   :  { %v8197_v43 = vsub.f32 %v8195_v51, %v8196_v52 }
 0x44c   :  { %v8198_v0 = vand.u32 4294901760, %v8197_v43 }
 0x44e   :  { %10854 = vmatmul.mubr.f32.vlgmr.msra.gmra.mrb[0].mxu1 %v6780_v36 }
 0x44f   :  { %11322 = vmatpush3.bf16.msra.mxu1 %v11321_v5  ;;  %10860 = vmatprep.mubr.msk.f32.mxu1 %vm11828_vm2, %v11829_v35 }
 0x450   :  { %11323 = vmatprep.subr.bf16.mxu1 %v11827_v3 }
 0x456   :  { %10861 = vmatmul.mubr.f32.vlgmr.msra.gmra.mrb[0].mxu1 %v6778_v7 }
 0x457   :  { %11325 = vmatpush3.bf16.msra.mxu1 %v11309_v48  ;;  %10867 = vmatprep.mubr.msk.f32.mxu1 %vm11828_vm2, %v11829_v35  ;;  %v8176_v48 = vand.u32 4294901760, %v12721_v13 }
 0x458   :  { %11326 = vmatprep.subr.bf16.mxu1 %v11827_v3 }
 0x459   :  { %v8177_v36 = vsub.f32 %v12721_v13, %v8176_v48 }
 0x45b   :  { %v8178_v16 = vand.u32 4294901760, %v8177_v36 }
 0x45d   :  { %v8179_v5 = vsub.f32 %v8177_v36, %v8178_v16 }
 0x45e   :  { %10868 = vmatmul.mubr.f32.vlgmr.msra.gmra.mrb[0].mxu1 %v6778_v7  ;;  %v8110_v7 = vand.u32 4294901760, %v9544_v49 }
 0x45f   :  { %11328 = vmatpush3.bf16.msra.mxu1 %v11327_v39  ;;  %10874 = vmatprep.mubr.msk.f32.mxu1 %vm11828_vm2, %v11829_v35  ;;  %v8180_v26 = vand.u32 4294901760, %v8179_v5 }
 0x460   :  { %11329 = vmatprep.subr.bf16.mxu1 %v11827_v3  ;;  %v8188_v30 = vsub.f32 %v9544_v49, %v8110_v7  ;;  %v11363_v17 = vpack.c.bf16 %v8113_v45, %v8110_v7 }
 0x462   :  { %v8189_v6 = vand.u32 4294901760, %v8188_v30  ;;  %v11369_v13 = vpack.c.bf16 %v8195_v51, %v8188_v30 }
 0x464   :  { %v8190_v27 = vsub.f32 %v8188_v30, %v8189_v6  ;;  %v11375_v10 = vpack.c.bf16 %v8196_v52, %v8189_v6 }
 0x466   :  { %10875 = vmatmul.mubr.f32.vlgmr.msra.gmra.mrb[0].mxu1 %v7248_v2  ;;  %v8191_v62 = vand.u32 4294901760, %v8190_v27 }
 0x467   :  { %11331 = vmatpush3.bf16.msra.mxu1 %v11330_v31  ;;  %10881 = vmatprep.mubr.msk.f32.mxu1 %vm11828_vm2, %v11829_v35 }
 0x468   :  { %11332 = vmatprep.subr.bf16.mxu1 %v11827_v3  ;;  %v11366_v1 = vpack.c.bf16 %v8198_v0, %v8191_v62 }
 0x46e   :  { %10882 = vmatmul.mubr.f32.vlgmr.msra.gmra.mrb[0].mxu1 %v7244_v37 }
 0x46f   :  { %11334 = vmatpush3.bf16.msra.mxu1 %v11333_v55  ;;  %10888 = vmatprep.mubr.msk.f32.mxu1 %vm11828_vm2, %v11829_v35 }
 0x470   :  { %11335 = vmatprep.subr.bf16.mxu1 %v11827_v3 }
 0x476   :  { %10889 = vmatmul.mubr.f32.vlgmr.msra.gmra.mrb[0].mxu1 %v7245_v25  ;;  %v8642_v25 = vand.u32 4294901760, %v12732_v44 }
 0x477   :  { %11337 = vmatpush3.bf16.msra.mxu1 %v11327_v39  ;;  %10895 = vmatprep.mubr.msk.f32.mxu1 %vm11828_vm2, %v11829_v35 }
 0x478   :  { %11338 = vmatprep.subr.bf16.mxu1 %v11827_v3  ;;  %v8643_v11 = vsub.f32 %v12732_v44, %v8642_v25 }
 0x47a   :  { %v8644_v21 = vand.u32 4294901760, %v8643_v11 }
 0x47c   :  { %v8645_v55 = vsub.f32 %v8643_v11, %v8644_v21 }
 0x47e   :  { %10896 = vmatmul.mubr.f32.vlgmr.msra.gmra.mrb[0].mxu1 %v7246_v54  ;;  %v8646_v56 = vand.u32 4294901760, %v8645_v55 }
 0x47f   :  { %11340 = vmatpush3.bf16.msra.mxu1 %v11339_v34  ;;  %10902 = vmatprep.mubr.msk.f32.mxu1 %vm11828_vm2, %v11829_v35 }
 0x480   :  { %11341 = vmatprep.subr.bf16.mxu1 %v11827_v3 }
 0x486   :  { %10903 = vmatmul.mubr.f32.vlgmr.msra.gmra.mrb[0].mxu1 %v7244_v37 }
 0x487   :  { %11343 = vmatpush3.bf16.msra.mxu1 %v11327_v39  ;;  %10909 = vmatprep.mubr.msk.f32.mxu1 %vm11828_vm2, %v11829_v35  ;;  %v8655_v39 = vand.u32 4294901760, %v8654_v8 }
 0x488   :  { %11344 = vmatprep.subr.bf16.mxu1 %v11827_v3 }
 0x489   :  { %v8656_v20 = vsub.f32 %v8654_v8, %v8655_v39 }
 0x48b   :  { %v8657_v31 = vand.u32 4294901760, %v8656_v20 }
 0x48e   :  { %10910 = vmatmul.mubr.f32.vlgmr.msra.gmra.mrb[0].mxu1 %v7244_v37  ;;  %v8579_v37 = vand.u32 4294901760, %v9547_v14 }
 0x48f   :  { %11346 = vmatpush3.bf16.msra.mxu1 %v11345_v12  ;;  %10916 = vmatprep.mubr.msk.f32.mxu1 %vm11828_vm2, %v11829_v35 }
 0x490   :  { %11347 = vmatprep.subr.bf16.mxu1 %v11827_v3  ;;  %v8661_v59 = vsub.f32 %v9547_v14, %v8579_v37  ;;  %v11381_v54 = vpack.c.bf16 %v8579_v37, %v8576_v61 }
 0x492   :  { %v8662_v41 = vand.u32 4294901760, %v8661_v59  ;;  %v11387_v44 = vpack.c.bf16 %v8661_v59, %v8654_v8 }
 0x494   :  { %v8663_v28 = vsub.f32 %v8661_v59, %v8662_v41  ;;  %v11393_v33 = vpack.c.bf16 %v8662_v41, %v8655_v39 }
 0x496   :  { %10917 = vmatmul.mubr.f32.vlgmr.msra.gmra.mrb[0].mxu1 %v7714_v19  ;;  %v8664_v2 = vand.u32 4294901760, %v8663_v28  ;;  %v9111_v19 = vsub.f32 %v9109_v53, %v9110_v42 }
 0x497   :  { %11349 = vmatpush3.bf16.msra.mxu1 %v11348_v4  ;;  %10923 = vmatprep.mubr.msk.f32.mxu1 %vm11828_vm2, %v11829_v35 }
 0x498   :  { %11350 = vmatprep.subr.bf16.mxu1 %v11827_v3  ;;  %v11384_v34 = vpack.c.bf16 %v8664_v2, %v8657_v31 }
 0x49e   :  { %10924 = vmatmul.mubr.f32.vlgmr.msra.gmra.mrb[0].mxu1 %v7710_v22 }
 0x49f   :  { %11352 = vmatpush3.bf16.msra.mxu1 %v11351_v50  ;;  %10930 = vmatprep.mubr.msk.f32.mxu1 %vm11828_vm2, %v11829_v35 }
 0x4a0   :  { %11353 = vmatprep.subr.bf16.mxu1 %v11827_v3 }
 0x4a6   :  { %10931 = vmatmul.mubr.f32.vlgmr.msra.gmra.mrb[0].mxu1 %v7711_v24 }
 0x4a7   :  { %11355 = vmatpush3.bf16.msra.mxu1 %v11345_v12  ;;  %10937 = vmatprep.mubr.msk.f32.mxu1 %vm11828_vm2, %v11829_v35 }
 0x4a8   :  { %11356 = vmatprep.subr.bf16.mxu1 %v11827_v3 }
 0x4ae   :  { %10938 = vmatmul.mubr.f32.vlgmr.msra.gmra.mrb[0].mxu1 %v7712_v29 }
 0x4af   :  { %11358 = vmatpush3.bf16.msra.mxu1 %v11357_v57  ;;  %10944 = vmatprep.mubr.msk.f32.mxu1 %vm11828_vm2, %v11829_v35  ;;  %v9112_v57 = vand.u32 4294901760, %v9111_v19 }
 0x4b0   :  { %11359 = vmatprep.subr.bf16.mxu1 %v11827_v3 }
 0x4b6   :  { %10945 = vmatmul.mubr.f32.vlgmr.msra.gmra.mrb[0].mxu1 %v7710_v22 }
 0x4b7   :  { %11361 = vmatpush3.bf16.msra.mxu1 %v11345_v12  ;;  %10951 = vmatprep.mubr.msk.f32.mxu1 %vm11828_vm2, %v11829_v35  ;;  %v9128_v12 = vand.u32 4294901760, %v9127_v47 }
 0x4b8   :  { %11362 = vmatprep.subr.bf16.mxu1 %v11827_v3 }
 0x4b9   :  { %v9129_v38 = vsub.f32 %v9127_v47, %v9128_v12 }
 0x4bb   :  { %v9130_v4 = vand.u32 4294901760, %v9129_v38 }
 0x4be   :  { %10952 = vmatmul.mubr.f32.vlgmr.msra.gmra.mrb[0].mxu1 %v7710_v22  ;;  %v9120_v22 = vsub.f32 %v9548_v15, %v9042_v40 }
 0x4bf   :  { %11364 = vmatpush3.bf16.msra.mxu1 %v11363_v17  ;;  %10958 = vmatprep.mubr.msk.f32.mxu1 %vm11828_vm2, %v11829_v35 }
 0x4c0   :  { %11365 = vmatprep.subr.bf16.mxu1 %v11827_v3  ;;  %v9121_v24 = vand.u32 4294901760, %v9120_v22  ;;  %v11405_v32 = vpack.c.bf16 %v9127_v47, %v9120_v22 }
 0x4c2   :  { %v9122_v29 = vsub.f32 %v9120_v22, %v9121_v24  ;;  %v11411_v49 = vpack.c.bf16 %v9128_v12, %v9121_v24 }
 0x4c4   :  { %v9123_v23 = vand.u32 4294901760, %v9122_v29 }
 0x4c6   :  { %10959 = vmatmul.mubr.f32.vlgmr.msra.gmra.mrb[0].mxu1 %v8180_v26  ;;  %v11402_v50 = vpack.c.bf16 %v9130_v4, %v9123_v23 }
 0x4c7   :  { %11367 = vmatpush3.bf16.msra.mxu1 %v11366_v1  ;;  %10965 = vmatprep.mubr.msk.f32.mxu1 %vm11828_vm2, %v11829_v35 }
 0x4c8   :  { %11368 = vmatprep.subr.bf16.mxu1 %v11827_v3 }
 0x4ce   :  { %10966 = vmatmul.mubr.f32.vlgmr.msra.gmra.mrb[0].mxu1 %v8176_v48 }
 0x4cf   :  { %11370 = vmatpush3.bf16.msra.mxu1 %v11369_v13  ;;  %10972 = vmatprep.mubr.msk.f32.mxu1 %vm11828_vm2, %v11829_v35 }
 0x4d0   :  { %11371 = vmatprep.subr.bf16.mxu1 %v11827_v3 }
 0x4d6   :  { %10973 = vmatmul.mubr.f32.vlgmr.msra.gmra.mrb[0].mxu1 %v8177_v36 }
 0x4d7   :  { %11373 = vmatpush3.bf16.msra.mxu1 %v11363_v17  ;;  %10979 = vmatprep.mubr.msk.f32.mxu1 %vm11828_vm2, %v11829_v35 }
 0x4d8   :  { %11374 = vmatprep.subr.bf16.mxu1 %v11827_v3 }
 0x4de   :  { %10980 = vmatmul.mubr.f32.vlgmr.msra.gmra.mrb[0].mxu1 %v8178_v16 }
 0x4df   :  { %11376 = vmatpush3.bf16.msra.mxu1 %v11375_v10  ;;  %10986 = vmatprep.mubr.msk.f32.mxu1 %vm11828_vm2, %v11829_v35 }
 0x4e0   :  { %11377 = vmatprep.subr.bf16.mxu1 %v11827_v3 }
 0x4e6   :  { %10987 = vmatmul.mubr.f32.vlgmr.msra.gmra.mrb[0].mxu1 %v8176_v48 }
 0x4e7   :  { %11379 = vmatpush3.bf16.msra.mxu1 %v11363_v17  ;;  %10993 = vmatprep.mubr.msk.f32.mxu1 %vm11828_vm2, %v11829_v35 }
 0x4e8   :  { %11380 = vmatprep.subr.bf16.mxu1 %v11827_v3 }
 0x4ee   :  { %10994 = vmatmul.mubr.f32.vlgmr.msra.gmra.mrb[0].mxu1 %v8176_v48 }
 0x4ef   :  { %11382 = vmatpush3.bf16.msra.mxu1 %v11381_v54  ;;  %11000 = vmatprep.mubr.msk.f32.mxu1 %vm11828_vm2, %v11829_v35 }
 0x4f0   :  { %11383 = vmatprep.subr.bf16.mxu1 %v11827_v3 }
 0x4f6   :  { %11001 = vmatmul.mubr.f32.vlgmr.msra.gmra.mrb[0].mxu1 %v8646_v56 }
 0x4f7   :  { %11385 = vmatpush3.bf16.msra.mxu1 %v11384_v34  ;;  %11007 = vmatprep.mubr.msk.f32.mxu1 %vm11828_vm2, %v11829_v35 }
 0x4f8   :  { %11386 = vmatprep.subr.bf16.mxu1 %v11827_v3 }
 0x4fe   :  { %11008 = vmatmul.mubr.f32.vlgmr.msra.gmra.mrb[0].mxu1 %v8642_v25 }
 0x4ff   :  { %11388 = vmatpush3.bf16.msra.mxu1 %v11387_v44  ;;  %11014 = vmatprep.mubr.msk.f32.mxu1 %vm11828_vm2, %v11829_v35 }
 0x500   :  { %11389 = vmatprep.subr.bf16.mxu1 %v11827_v3 }
 0x506   :  { %11015 = vmatmul.mubr.f32.vlgmr.msra.gmra.mrb[0].mxu1 %v8643_v11 }
 0x507   :  { %11391 = vmatpush3.bf16.msra.mxu1 %v11381_v54  ;;  %11021 = vmatprep.mubr.msk.f32.mxu1 %vm11828_vm2, %v11829_v35 }
 0x508   :  { %11392 = vmatprep.subr.bf16.mxu1 %v11827_v3 }
 0x50e   :  { %11022 = vmatmul.mubr.f32.vlgmr.msra.gmra.mrb[0].mxu1 %v8644_v21 }
 0x50f   :  { %11394 = vmatpush3.bf16.msra.mxu1 %v11393_v33  ;;  %11028 = vmatprep.mubr.msk.f32.mxu1 %vm11828_vm2, %v11829_v35 }
 0x510   :  { %11395 = vmatprep.subr.bf16.mxu1 %v11827_v3 }
 0x516   :  { %11029 = vmatmul.mubr.f32.vlgmr.msra.gmra.mrb[0].mxu1 %v8642_v25 }
 0x517   :  { %11397 = vmatpush3.bf16.msra.mxu1 %v11381_v54  ;;  %11035 = vmatprep.mubr.msk.f32.mxu1 %vm11828_vm2, %v11829_v35 }
 0x518   :  { %11398 = vmatprep.subr.bf16.mxu1 %v11827_v3 }
 0x51e   :  { %11036 = vmatmul.mubr.f32.vlgmr.msra.gmra.mrb[0].mxu1 %v8642_v25 }
 0x51f   :  { %11400 = vmatpush3.bf16.msra.mxu1 %v11399_v46  ;;  %11042 = vmatprep.mubr.msk.f32.mxu1 %vm11828_vm2, %v11829_v35 }
 0x520   :  { %11401 = vmatprep.subr.bf16.mxu1 %v11827_v3 }
 0x526   :  { %11043 = vmatmul.mubr.f32.vlgmr.msra.gmra.mrb[0].mxu1 %v9112_v57 }
 0x527   :  { %11403 = vmatpush3.bf16.msra.mxu1 %v11402_v50  ;;  %11049 = vmatprep.mubr.msk.f32.mxu1 %vm11828_vm2, %v11829_v35 }
 0x528   :  { %11404 = vmatprep.subr.bf16.mxu1 %v11827_v3 }
 0x52e   :  { %11050 = vmatmul.mubr.f32.vlgmr.msra.gmra.mrb[0].mxu1 %v9108_v58 }
 0x52f   :  { %11406 = vmatpush3.bf16.msra.mxu1 %v11405_v32  ;;  %11056 = vmatprep.mubr.msk.f32.mxu1 %vm11828_vm2, %v11829_v35 }
 0x530   :  { %11407 = vmatprep.subr.bf16.mxu1 %v11827_v3 }
 0x536   :  { %11057 = vmatmul.mubr.f32.vlgmr.msra.gmra.mrb[0].mxu1 %v9109_v53 }
 0x537   :  { %11409 = vmatpush3.bf16.msra.mxu1 %v11399_v46  ;;  %11063 = vmatprep.mubr.msk.f32.mxu1 %vm11828_vm2, %v11829_v35 }
 0x538   :  { %11410 = vmatprep.subr.bf16.mxu1 %v11827_v3 }
 0x53e   :  { %11064 = vmatmul.mubr.f32.vlgmr.msra.gmra.mrb[0].mxu1 %v9110_v42 }
 0x53f   :  { %11412 = vmatpush3.bf16.msra.mxu1 %v11411_v49  ;;  %11070 = vmatprep.mubr.msk.f32.mxu1 %vm11828_vm2, %v11829_v35 }
 0x540   :  { %11413 = vmatprep.subr.bf16.mxu1 %v11827_v3 }
 0x546   :  { %11071 = vmatmul.mubr.f32.vlgmr.msra.gmra.mrb[0].mxu1 %v9108_v58 }
 0x547   :  { %11415 = vmatpush3.bf16.msra.mxu1 %v11399_v46  ;;  %11077 = vmatprep.mubr.msk.f32.mxu1 %vm11828_vm2, %v11829_v35 }
 0x54e   :  { %11078 = vmatmul.mubr.f32.vlgmr.msra.gmra.mrb[0].mxu1 %v9108_v58 }
 0x621   :  { %v9496_v7 = vpop.f32.mrb[0].mxu1 }
 0x622   :  { %v11448_v45 = vadd.f32 %v9519_v63, %v9496_v7  ;;  %v11079_v30 = vpop.f32.mrb[1].mxu1 }
 0x624   :  { %v9501_v51 = vmax.f32 %v11448_v45, 0.0 }
 0x626   :  { %9503 = vst.msk [vmem:[#allocation2] sm:$0xff] %vm9502_vm4, %v9501_v51 }
 0x627   :  { %11814 = shalt.err (!%p11811_p4)
}
 0x628   :  { %s11815_s3 = scalar_lea.hbm %s13158_s4, 128 }
 0x629   :  { %p11816_p5 = scmp.ne.s32.totalorder %s13158_s4, %s11815_s3  ;;  %p11819_p6 = scmp.lt.u32.totalorder %s11815_s3, %s13158_s4 }
 0x62b   :  { %p11821_p7 = pnand %p11819_p6, %p11816_p5 }
 0x62d   :  { %11824 = shalt.err (!%p11821_p7)
}
 0x62e   :  { %9513 = dma.vmem_to_hbm [thread:$0]  %s9511_s19, 128, %s13158_s4, [#allocation3]  }
 0x62f   :  { %11825 = dma.done.wait [#allocation3], 128  }
 0x630   :  { %11826 = vsyncadd [#allocation3], 4294967168 }
 0x631   :  { %9517 = vsyncpa [#allocation3], 1 }

</bundles_post_ra>
